<compile_context>
chip_gen: v6e
topology: v6e:2x2x1
jax: 0.10.0
libtpu: 0.0.40
codegen_flags: <defaults>
</compile_context>

<pallas_src>
import functools

import jax
import jax.numpy as jnp
from jax import lax
from jax.experimental import pallas as pl
from jax.experimental.pallas import tpu as pltpu

EPS = 1e-5


def _residual_block_kernel(x_ref, w1_ref, w2_ref, bn_ref, cavg_ref, out_ref,
                           xpad_ref, slab_ref, *, n, h, w, c):
    # x_ref    : (N*H, W*C)          input == identity branch (lane-fused NHWC)
    # w1_ref   : (9*W*C, W*C)        conv1 taps as a block matmul weight
    # w2_ref   : (9*W*C, W*C)        conv2 taps
    # bn_ref   : (4, W*C)            rows: gamma1, beta1, gamma2, beta2 (lane-tiled)
    # cavg_ref : (W*C, W*C)          channel selector: [j,k] = 1 iff j%C == k%C
    # out_ref  : (N*H, W*C)
    # xpad_ref : VMEM (N, H+2, (W+2)*C)  zero-halo padded activation (reused)
    # slab_ref : VMEM (N*H, 9*W*C)       im2col slab (reused for both convs)
    wc = w * c
    wpc = (w + 2) * c
    m = n * h * w
    inv_m = 1.0 / m

    x_flat = x_ref[...]                                    # (N*H, W*C)

    # ---- zero ONLY the 1-pixel halo ring; it stays zero for both convs ----
    xpad_ref[:, 0:1, :] = jnp.zeros((n, 1, wpc), jnp.float32)
    xpad_ref[:, h + 1:h + 2, :] = jnp.zeros((n, 1, wpc), jnp.float32)
    xpad_ref[:, :, 0:c] = jnp.zeros((n, h + 2, c), jnp.float32)
    xpad_ref[:, :, (w + 1) * c:(w + 2) * c] = jnp.zeros((n, h + 2, c), jnp.float32)

    def conv3x3(w_ref):
        # Each of the 9 shifted tap views is a plain 2-D slice of the fused-
        # lane padded scratch.  Build the (N*H, 9*W*C) slab once, then a
        # single MXU matmul with K = 9*W*C replaces 9 tiny K=C matmuls.
        for t in range(9):
            dh, dw = divmod(t, 3)
            view = xpad_ref[:, dh:dh + h, dw * c:dw * c + wc]   # (N, H, W*C)
            slab_ref[:, t * wc:(t + 1) * wc] = view.reshape(n * h, wc)
        return jnp.dot(slab_ref[...], w_ref[...],
                       preferred_element_type=jnp.float32)      # (N*H, W*C)

    def bn_scale_shift(y, gamma_l, beta_l):
        # Training-mode BatchNorm, single-pass statistics.  The per-channel
        # collapse / re-broadcast is one small matmul against the channel
        # selector, keeping the whole computation lane-dense.
        rs = jnp.sum(y, axis=0, keepdims=True)                  # (1, W*C)
        rss = jnp.sum(y * y, axis=0, keepdims=True)             # (1, W*C)
        mean_l = jnp.dot(rs, cavg_ref[...]) * inv_m             # per-channel mean,
        ex2_l = jnp.dot(rss, cavg_ref[...]) * inv_m             #   broadcast to lanes
        var_l = ex2_l - mean_l * mean_l
        scale_l = gamma_l * lax.rsqrt(var_l + EPS)
        shift_l = beta_l - mean_l * scale_l
        return scale_l, shift_l                                 # (1, W*C) each

    g1_l, b1_l = bn_ref[0:1, :], bn_ref[1:2, :]
    g2_l, b2_l = bn_ref[2:3, :], bn_ref[3:4, :]

    # ---- conv1 -> bn1 -> relu ----
    xpad_ref[:, 1:h + 1, c:(w + 1) * c] = x_flat.reshape(n, h, wc)
    y1 = conv3x3(w1_ref)
    sc1, sh1 = bn_scale_shift(y1, g1_l, b1_l)
    h1 = jnp.maximum(y1 * sc1 + sh1, 0.0)

    # ---- conv2 -> bn2 (re-pad interior; halo is still zero) ----
    xpad_ref[:, 1:h + 1, c:(w + 1) * c] = h1.reshape(n, h, wc)
    y2 = conv3x3(w2_ref)
    sc2, sh2 = bn_scale_shift(y2, g2_l, b2_l)

    # ---- bn2 affine + residual add + relu: one lane-dense store ----
    out_ref[...] = jnp.maximum(y2 * sc2 + sh2 + x_flat, 0.0).astype(out_ref.dtype)


def _expand_conv_weight(w_hwio, width):
    """(3,3,Cin,Cout) HWIO -> (9*W*Cin, W*Cout) block weight.

    With W and C fused into the lane axis, applying tap (dh, dw) to a shifted
    (N*H, W*C) slice is a block-diagonal matmul (the (Cin, Cout) tap matrix
    repeated along the W columns); stacking the 9 taps along K yields a single
    matmul per conv.  This inflates the tiny 3x3xCxC weights by WxW, a good
    trade at C=4; for realistic channel counts use a dense (9C, C) im2col.
    """
    eye_w = jnp.eye(width, dtype=w_hwio.dtype)
    blocks = [jnp.kron(eye_w, w_hwio[dh, dw])
              for dh in range(3) for dw in range(3)]
    return jnp.concatenate(blocks, axis=0)


@jax.jit
def residual_block(x_nhwc, w1_hwio, w2_hwio, gamma1, beta1, gamma2, beta2):
    n, h, w, c = x_nhwc.shape
    wc = w * c

    # Wrapper-side prep: contiguous reshapes / tiny weight reformatting only
    # (no jnp.pad of the activation, no duplicated activation input).
    x_flat = x_nhwc.reshape(n * h, wc)
    w1_big = _expand_conv_weight(w1_hwio, w)
    w2_big = _expand_conv_weight(w2_hwio, w)
    # BN affine params tiled to lane width: lane j holds channel j % C.
    bn_lane = jnp.tile(
        jnp.stack([gamma1, beta1, gamma2, beta2]).astype(jnp.float32), (1, w))
    # Channel selector: cavg[j, k] = 1 iff lanes j and k hold the same channel.
    chan_avg = jnp.kron(jnp.ones((w, w), jnp.float32),
                        jnp.eye(c, dtype=jnp.float32))

    kernel = functools.partial(_residual_block_kernel, n=n, h=h, w=w, c=c)
    out_flat = pl.pallas_call(
        kernel,
        out_shape=jax.ShapeDtypeStruct((n * h, wc), x_nhwc.dtype),
        scratch_shapes=[
            pltpu.VMEM((n, h + 2, (w + 2) * c), jnp.float32),   # halo-padded act
            pltpu.VMEM((n * h, 9 * wc), jnp.float32),           # im2col slab
        ],
        compiler_params=pltpu.CompilerParams(
            # Monolithic (gridless) form: size scoped VMEM explicitly so the
            # same kernel is also within v7x's 64 MiB budget.
            vmem_limit_bytes=32 * 1024 * 1024),
    )(x_flat, w1_big, w2_big, bn_lane, chan_avg)
    return out_flat.reshape(n, h, w, c)


def _reference(x_nhwc, w1_hwio, w2_hwio, gamma1, beta1, gamma2, beta2):
    def bn(y, g, b):
        mu = y.mean(axis=(0, 1, 2))
        var = ((y - mu) ** 2).mean(axis=(0, 1, 2))
        return (y - mu) * lax.rsqrt(var + EPS) * g + b

    def conv(y, wgt):
        return lax.conv_general_dilated(
            y, wgt, window_strides=(1, 1), padding="SAME",
            dimension_numbers=("NHWC", "HWIO", "NHWC"))

    y = jnp.maximum(bn(conv(x_nhwc, w1_hwio), gamma1, beta1), 0.0)
    y = bn(conv(y, w2_hwio), gamma2, beta2)
    return jnp.maximum(y + x_nhwc, 0.0)


if __name__ == "__main__":
    N, C, H, W = 2, 4, 16, 16  # in_channels == out_channels, stride=1, no downsample
    key = jax.random.PRNGKey(0)
    k_x, k_w1, k_w2, k_g1, k_b1, k_g2, k_b2 = jax.random.split(key, 7)

    # Input in PyTorch NCHW convention, transposed once to NHWC for the kernel.
    x_nchw = jax.random.normal(k_x, (N, C, H, W), dtype=jnp.float32)
    x_nhwc = jnp.transpose(x_nchw, (0, 2, 3, 1))

    # Conv weights in PyTorch OIHW shape, transposed to HWIO.
    w1_oihw = 0.1 * jax.random.normal(k_w1, (C, C, 3, 3), dtype=jnp.float32)
    w2_oihw = 0.1 * jax.random.normal(k_w2, (C, C, 3, 3), dtype=jnp.float32)
    w1_hwio = jnp.transpose(w1_oihw, (2, 3, 1, 0))
    w2_hwio = jnp.transpose(w2_oihw, (2, 3, 1, 0))

    # BatchNorm affine params (deterministic, non-trivial).
    gamma1 = 1.0 + 0.1 * jax.random.normal(k_g1, (C,), dtype=jnp.float32)
    beta1 = 0.1 * jax.random.normal(k_b1, (C,), dtype=jnp.float32)
    gamma2 = 1.0 + 0.1 * jax.random.normal(k_g2, (C,), dtype=jnp.float32)
    beta2 = 0.1 * jax.random.normal(k_b2, (C,), dtype=jnp.float32)

    out = residual_block(x_nhwc, w1_hwio, w2_hwio, gamma1, beta1, gamma2, beta2)
    out = jax.block_until_ready(out)

    ref = _reference(x_nhwc, w1_hwio, w2_hwio, gamma1, beta1, gamma2, beta2)
    assert jnp.allclose(out, ref, rtol=1e-3, atol=1e-3), "mismatch vs JAX reference"

    print("KERNEL_OK")
</pallas_src>

<mosaic_0001>
module attributes {stable_mosaic.version = 11 : i64} {
  func.func @_residual_block_kernel(%arg0: memref<32x64xf32, #tpu.memory_space<vmem>>, %arg1: memref<576x64xf32, #tpu.memory_space<vmem>>, %arg2: memref<576x64xf32, #tpu.memory_space<vmem>>, %arg3: memref<4x64xf32, #tpu.memory_space<vmem>>, %arg4: memref<64x64xf32, #tpu.memory_space<vmem>>, %arg5: memref<32x64xf32, #tpu.memory_space<vmem>>, %arg6: memref<2x18x72xf32, #tpu.memory_space<vmem>>, %arg7: memref<32x576xf32, #tpu.memory_space<vmem>>) attributes {dimension_semantics = [], scalar_prefetch = 0 : i64, scratch_operands = 2 : i64, tpu.core_type = #tpu.core_type<tc>} {
    %c0 = arith.constant 0 : index
    %c0_0 = arith.constant 0 : index
    %0 = vector.load %arg0[%c0, %c0_0] : memref<32x64xf32, #tpu.memory_space<vmem>>, vector<32x64xf32>
    %cst = arith.constant 0.000000e+00 : f32
    %1 = vector.broadcast %cst : f32 to vector<2x1x72xf32>
    %c0_1 = arith.constant 0 : index
    %c0_2 = arith.constant 0 : index
    %c0_3 = arith.constant 0 : index
    %2 = vector.load %arg6[%c0_1, %c0_2, %c0_3] : memref<2x18x72xf32, #tpu.memory_space<vmem>>, vector<2x1x72xf32>
    tpu.vector_store %arg6[%c0_1, %c0_2, %c0_3], %1 {strides = array<i32>} : memref<2x18x72xf32, #tpu.memory_space<vmem>>, vector<2x1x72xf32>,
    %cst_4 = arith.constant 0.000000e+00 : f32
    %3 = vector.broadcast %cst_4 : f32 to vector<2x1x72xf32>
    %c0_5 = arith.constant 0 : index
    %c17 = arith.constant 17 : index
    %c0_6 = arith.constant 0 : index
    %4 = vector.load %arg6[%c0_5, %c17, %c0_6] : memref<2x18x72xf32, #tpu.memory_space<vmem>>, vector<2x1x72xf32>
    tpu.vector_store %arg6[%c0_5, %c17, %c0_6], %3 {strides = array<i32>} : memref<2x18x72xf32, #tpu.memory_space<vmem>>, vector<2x1x72xf32>,
    %cst_7 = arith.constant 0.000000e+00 : f32
    %5 = vector.broadcast %cst_7 : f32 to vector<2x18x4xf32>
    %c0_8 = arith.constant 0 : index
    %c0_9 = arith.constant 0 : index
    %c0_10 = arith.constant 0 : index
    %6 = vector.load %arg6[%c0_8, %c0_9, %c0_10] : memref<2x18x72xf32, #tpu.memory_space<vmem>>, vector<2x18x4xf32>
    tpu.vector_store %arg6[%c0_8, %c0_9, %c0_10], %5 {strides = array<i32>} : memref<2x18x72xf32, #tpu.memory_space<vmem>>, vector<2x18x4xf32>,
    %cst_11 = arith.constant 0.000000e+00 : f32
    %7 = vector.broadcast %cst_11 : f32 to vector<2x18x4xf32>
    %c0_12 = arith.constant 0 : index
    %c0_13 = arith.constant 0 : index
    %c68 = arith.constant 68 : index
    %8 = vector.load %arg6[%c0_12, %c0_13, %c68] : memref<2x18x72xf32, #tpu.memory_space<vmem>>, vector<2x18x4xf32>
    tpu.vector_store %arg6[%c0_12, %c0_13, %c68], %7 {strides = array<i32>} : memref<2x18x72xf32, #tpu.memory_space<vmem>>, vector<2x18x4xf32>,
    %c0_14 = arith.constant 0 : index
    %c0_15 = arith.constant 0 : index
    %9 = vector.load %arg3[%c0_14, %c0_15] : memref<4x64xf32, #tpu.memory_space<vmem>>, vector<1x64xf32>
    %c1 = arith.constant 1 : index
    %c0_16 = arith.constant 0 : index
    %10 = vector.load %arg3[%c1, %c0_16] : memref<4x64xf32, #tpu.memory_space<vmem>>, vector<1x64xf32>
    %c2 = arith.constant 2 : index
    %c0_17 = arith.constant 0 : index
    %11 = vector.load %arg3[%c2, %c0_17] : memref<4x64xf32, #tpu.memory_space<vmem>>, vector<1x64xf32>
    %c3 = arith.constant 3 : index
    %c0_18 = arith.constant 0 : index
    %12 = vector.load %arg3[%c3, %c0_18] : memref<4x64xf32, #tpu.memory_space<vmem>>, vector<1x64xf32>
    %13 = vector.shape_cast %0 : vector<32x64xf32> to vector<2x16x64xf32>
    %c0_19 = arith.constant 0 : index
    %c1_20 = arith.constant 1 : index
    %c4 = arith.constant 4 : index
    %14 = vector.load %arg6[%c0_19, %c1_20, %c4] : memref<2x18x72xf32, #tpu.memory_space<vmem>>, vector<2x16x64xf32>
    tpu.vector_store %arg6[%c0_19, %c1_20, %c4], %13 {strides = array<i32>} : memref<2x18x72xf32, #tpu.memory_space<vmem>>, vector<2x16x64xf32>,
    %c0_21 = arith.constant 0 : index
    %c0_22 = arith.constant 0 : index
    %c0_23 = arith.constant 0 : index
    %15 = vector.load %arg6[%c0_21, %c0_22, %c0_23] : memref<2x18x72xf32, #tpu.memory_space<vmem>>, vector<2x16x64xf32>
    %16 = vector.shape_cast %15 : vector<2x16x64xf32> to vector<32x64xf32>
    %c0_24 = arith.constant 0 : index
    %c0_25 = arith.constant 0 : index
    %17 = vector.load %arg7[%c0_24, %c0_25] : memref<32x576xf32, #tpu.memory_space<vmem>>, vector<32x64xf32>
    tpu.vector_store %arg7[%c0_24, %c0_25], %16 {strides = array<i32>} : memref<32x576xf32, #tpu.memory_space<vmem>>, vector<32x64xf32>,
    %c0_26 = arith.constant 0 : index
    %c0_27 = arith.constant 0 : index
    %c4_28 = arith.constant 4 : index
    %18 = vector.load %arg6[%c0_26, %c0_27, %c4_28] : memref<2x18x72xf32, #tpu.memory_space<vmem>>, vector<2x16x64xf32>
    %19 = vector.shape_cast %18 : vector<2x16x64xf32> to vector<32x64xf32>
    %c0_29 = arith.constant 0 : index
    %c64 = arith.constant 64 : index
    %20 = vector.load %arg7[%c0_29, %c64] : memref<32x576xf32, #tpu.memory_space<vmem>>, vector<32x64xf32>
    tpu.vector_store %arg7[%c0_29, %c64], %19 {strides = array<i32>} : memref<32x576xf32, #tpu.memory_space<vmem>>, vector<32x64xf32>,
    %c0_30 = arith.constant 0 : index
    %c0_31 = arith.constant 0 : index
    %c8 = arith.constant 8 : index
    %21 = vector.load %arg6[%c0_30, %c0_31, %c8] : memref<2x18x72xf32, #tpu.memory_space<vmem>>, vector<2x16x64xf32>
    %22 = vector.shape_cast %21 : vector<2x16x64xf32> to vector<32x64xf32>
    %c0_32 = arith.constant 0 : index
    %c128 = arith.constant 128 : index
    %23 = vector.load %arg7[%c0_32, %c128] : memref<32x576xf32, #tpu.memory_space<vmem>>, vector<32x64xf32>
    tpu.vector_store %arg7[%c0_32, %c128], %22 {strides = array<i32>} : memref<32x576xf32, #tpu.memory_space<vmem>>, vector<32x64xf32>,
    %c0_33 = arith.constant 0 : index
    %c1_34 = arith.constant 1 : index
    %c0_35 = arith.constant 0 : index
    %24 = vector.load %arg6[%c0_33, %c1_34, %c0_35] : memref<2x18x72xf32, #tpu.memory_space<vmem>>, vector<2x16x64xf32>
    %25 = vector.shape_cast %24 : vector<2x16x64xf32> to vector<32x64xf32>
    %c0_36 = arith.constant 0 : index
    %c192 = arith.constant 192 : index
    %26 = vector.load %arg7[%c0_36, %c192] : memref<32x576xf32, #tpu.memory_space<vmem>>, vector<32x64xf32>
    tpu.vector_store %arg7[%c0_36, %c192], %25 {strides = array<i32>} : memref<32x576xf32, #tpu.memory_space<vmem>>, vector<32x64xf32>,
    %c0_37 = arith.constant 0 : index
    %c1_38 = arith.constant 1 : index
    %c4_39 = arith.constant 4 : index
    %27 = vector.load %arg6[%c0_37, %c1_38, %c4_39] : memref<2x18x72xf32, #tpu.memory_space<vmem>>, vector<2x16x64xf32>
    %28 = vector.shape_cast %27 : vector<2x16x64xf32> to vector<32x64xf32>
    %c0_40 = arith.constant 0 : index
    %c256 = arith.constant 256 : index
    %29 = vector.load %arg7[%c0_40, %c256] : memref<32x576xf32, #tpu.memory_space<vmem>>, vector<32x64xf32>
    tpu.vector_store %arg7[%c0_40, %c256], %28 {strides = array<i32>} : memref<32x576xf32, #tpu.memory_space<vmem>>, vector<32x64xf32>,
    %c0_41 = arith.constant 0 : index
    %c1_42 = arith.constant 1 : index
    %c8_43 = arith.constant 8 : index
    %30 = vector.load %arg6[%c0_41, %c1_42, %c8_43] : memref<2x18x72xf32, #tpu.memory_space<vmem>>, vector<2x16x64xf32>
    %31 = vector.shape_cast %30 : vector<2x16x64xf32> to vector<32x64xf32>
    %c0_44 = arith.constant 0 : index
    %c320 = arith.constant 320 : index
    %32 = vector.load %arg7[%c0_44, %c320] : memref<32x576xf32, #tpu.memory_space<vmem>>, vector<32x64xf32>
    tpu.vector_store %arg7[%c0_44, %c320], %31 {strides = array<i32>} : memref<32x576xf32, #tpu.memory_space<vmem>>, vector<32x64xf32>,
    %c0_45 = arith.constant 0 : index
    %c2_46 = arith.constant 2 : index
    %c0_47 = arith.constant 0 : index
    %33 = vector.load %arg6[%c0_45, %c2_46, %c0_47] : memref<2x18x72xf32, #tpu.memory_space<vmem>>, vector<2x16x64xf32>
    %34 = vector.shape_cast %33 : vector<2x16x64xf32> to vector<32x64xf32>
    %c0_48 = arith.constant 0 : index
    %c384 = arith.constant 384 : index
    %35 = vector.load %arg7[%c0_48, %c384] : memref<32x576xf32, #tpu.memory_space<vmem>>, vector<32x64xf32>
    tpu.vector_store %arg7[%c0_48, %c384], %34 {strides = array<i32>} : memref<32x576xf32, #tpu.memory_space<vmem>>, vector<32x64xf32>,
    %c0_49 = arith.constant 0 : index
    %c2_50 = arith.constant 2 : index
    %c4_51 = arith.constant 4 : index
    %36 = vector.load %arg6[%c0_49, %c2_50, %c4_51] : memref<2x18x72xf32, #tpu.memory_space<vmem>>, vector<2x16x64xf32>
    %37 = vector.shape_cast %36 : vector<2x16x64xf32> to vector<32x64xf32>
    %c0_52 = arith.constant 0 : index
    %c448 = arith.constant 448 : index
    %38 = vector.load %arg7[%c0_52, %c448] : memref<32x576xf32, #tpu.memory_space<vmem>>, vector<32x64xf32>
    tpu.vector_store %arg7[%c0_52, %c448], %37 {strides = array<i32>} : memref<32x576xf32, #tpu.memory_space<vmem>>, vector<32x64xf32>,
    %c0_53 = arith.constant 0 : index
    %c2_54 = arith.constant 2 : index
    %c8_55 = arith.constant 8 : index
    %39 = vector.load %arg6[%c0_53, %c2_54, %c8_55] : memref<2x18x72xf32, #tpu.memory_space<vmem>>, vector<2x16x64xf32>
    %40 = vector.shape_cast %39 : vector<2x16x64xf32> to vector<32x64xf32>
    %c0_56 = arith.constant 0 : index
    %c512 = arith.constant 512 : index
    %41 = vector.load %arg7[%c0_56, %c512] : memref<32x576xf32, #tpu.memory_space<vmem>>, vector<32x64xf32>
    tpu.vector_store %arg7[%c0_56, %c512], %40 {strides = array<i32>} : memref<32x576xf32, #tpu.memory_space<vmem>>, vector<32x64xf32>,
    %c0_57 = arith.constant 0 : index
    %c0_58 = arith.constant 0 : index
    %42 = vector.load %arg7[%c0_57, %c0_58] : memref<32x576xf32, #tpu.memory_space<vmem>>, vector<32x576xf32>
    %c0_59 = arith.constant 0 : index
    %c0_60 = arith.constant 0 : index
    %43 = vector.load %arg1[%c0_59, %c0_60] : memref<576x64xf32, #tpu.memory_space<vmem>>, vector<576x64xf32>
    %cst_61 = arith.constant dense<0.000000e+00> : vector<32x64xf32>
    %44 = tpu.matmul %42, %43, %cst_61 {dimension_numbers = #tpu.dot_dimension_numbers<[1], [0], [0], [1], [0, 0, 1, 1], [], []>} : vector<32x576xf32>, vector<576x64xf32>, vector<32x64xf32> -> vector<32x64xf32>
    %cst_62 = arith.constant dense<0.000000e+00> : vector<64xf32>
    %45 = vector.multi_reduction <add>, %44, %cst_62 [0] : vector<32x64xf32> to vector<64xf32>
    %46 = vector.shape_cast %45 : vector<64xf32> to vector<1x64xf32>
    %47 = arith.mulf %44, %44 : vector<32x64xf32>
    %cst_63 = arith.constant dense<0.000000e+00> : vector<64xf32>
    %48 = vector.multi_reduction <add>, %47, %cst_63 [0] : vector<32x64xf32> to vector<64xf32>
    %49 = vector.shape_cast %48 : vector<64xf32> to vector<1x64xf32>
    %c0_64 = arith.constant 0 : index
    %c0_65 = arith.constant 0 : index
    %50 = vector.load %arg4[%c0_64, %c0_65] : memref<64x64xf32, #tpu.memory_space<vmem>>, vector<64x64xf32>
    %cst_66 = arith.constant dense<0.000000e+00> : vector<1x64xf32>
    %51 = tpu.matmul %46, %50, %cst_66 {dimension_numbers = #tpu.dot_dimension_numbers<[1], [0], [0], [1], [0, 0, 1, 1], [], []>} : vector<1x64xf32>, vector<64x64xf32>, vector<1x64xf32> -> vector<1x64xf32>
    %cst_67 = arith.constant 0.001953125 : f32
    %52 = vector.broadcast %cst_67 : f32 to vector<1x64xf32>
    %53 = arith.mulf %51, %52 : vector<1x64xf32>
    %c0_68 = arith.constant 0 : index
    %c0_69 = arith.constant 0 : index
    %54 = vector.load %arg4[%c0_68, %c0_69] : memref<64x64xf32, #tpu.memory_space<vmem>>, vector<64x64xf32>
    %cst_70 = arith.constant dense<0.000000e+00> : vector<1x64xf32>
    %55 = tpu.matmul %49, %54, %cst_70 {dimension_numbers = #tpu.dot_dimension_numbers<[1], [0], [0], [1], [0, 0, 1, 1], [], []>} : vector<1x64xf32>, vector<64x64xf32>, vector<1x64xf32> -> vector<1x64xf32>
    %cst_71 = arith.constant 0.001953125 : f32
    %56 = vector.broadcast %cst_71 : f32 to vector<1x64xf32>
    %57 = arith.mulf %55, %56 : vector<1x64xf32>
    %58 = arith.mulf %53, %53 : vector<1x64xf32>
    %59 = arith.subf %57, %58 : vector<1x64xf32>
    %cst_72 = arith.constant 9.99999974E-6 : f32
    %60 = vector.broadcast %cst_72 : f32 to vector<1x64xf32>
    %61 = arith.addf %59, %60 : vector<1x64xf32>
    %62 = math.rsqrt %61 : vector<1x64xf32>
    %63 = arith.mulf %9, %62 : vector<1x64xf32>
    %64 = arith.mulf %53, %63 : vector<1x64xf32>
    %65 = arith.subf %10, %64 : vector<1x64xf32>
    %66 = vector.broadcast %63 : vector<1x64xf32> to vector<32x64xf32>
    %67 = arith.mulf %44, %66 : vector<32x64xf32>
    %68 = vector.broadcast %65 : vector<1x64xf32> to vector<32x64xf32>
    %69 = arith.addf %67, %68 : vector<32x64xf32>
    %cst_73 = arith.constant 0.000000e+00 : f32
    %70 = vector.broadcast %cst_73 : f32 to vector<32x64xf32>
    %71 = arith.maximumf %69, %70 : vector<32x64xf32>
    %72 = vector.shape_cast %71 : vector<32x64xf32> to vector<2x16x64xf32>
    %c0_74 = arith.constant 0 : index
    %c1_75 = arith.constant 1 : index
    %c4_76 = arith.constant 4 : index
    %73 = vector.load %arg6[%c0_74, %c1_75, %c4_76] : memref<2x18x72xf32, #tpu.memory_space<vmem>>, vector<2x16x64xf32>
    tpu.vector_store %arg6[%c0_74, %c1_75, %c4_76], %72 {strides = array<i32>} : memref<2x18x72xf32, #tpu.memory_space<vmem>>, vector<2x16x64xf32>,
    %c0_77 = arith.constant 0 : index
    %c0_78 = arith.constant 0 : index
    %c0_79 = arith.constant 0 : index
    %74 = vector.load %arg6[%c0_77, %c0_78, %c0_79] : memref<2x18x72xf32, #tpu.memory_space<vmem>>, vector<2x16x64xf32>
    %75 = vector.shape_cast %74 : vector<2x16x64xf32> to vector<32x64xf32>
    %c0_80 = arith.constant 0 : index
    %c0_81 = arith.constant 0 : index
    %76 = vector.load %arg7[%c0_80, %c0_81] : memref<32x576xf32, #tpu.memory_space<vmem>>, vector<32x64xf32>
    tpu.vector_store %arg7[%c0_80, %c0_81], %75 {strides = array<i32>} : memref<32x576xf32, #tpu.memory_space<vmem>>, vector<32x64xf32>,
    %c0_82 = arith.constant 0 : index
    %c0_83 = arith.constant 0 : index
    %c4_84 = arith.constant 4 : index
    %77 = vector.load %arg6[%c0_82, %c0_83, %c4_84] : memref<2x18x72xf32, #tpu.memory_space<vmem>>, vector<2x16x64xf32>
    %78 = vector.shape_cast %77 : vector<2x16x64xf32> to vector<32x64xf32>
    %c0_85 = arith.constant 0 : index
    %c64_86 = arith.constant 64 : index
    %79 = vector.load %arg7[%c0_85, %c64_86] : memref<32x576xf32, #tpu.memory_space<vmem>>, vector<32x64xf32>
    tpu.vector_store %arg7[%c0_85, %c64_86], %78 {strides = array<i32>} : memref<32x576xf32, #tpu.memory_space<vmem>>, vector<32x64xf32>,
    %c0_87 = arith.constant 0 : index
    %c0_88 = arith.constant 0 : index
    %c8_89 = arith.constant 8 : index
    %80 = vector.load %arg6[%c0_87, %c0_88, %c8_89] : memref<2x18x72xf32, #tpu.memory_space<vmem>>, vector<2x16x64xf32>
    %81 = vector.shape_cast %80 : vector<2x16x64xf32> to vector<32x64xf32>
    %c0_90 = arith.constant 0 : index
    %c128_91 = arith.constant 128 : index
    %82 = vector.load %arg7[%c0_90, %c128_91] : memref<32x576xf32, #tpu.memory_space<vmem>>, vector<32x64xf32>
    tpu.vector_store %arg7[%c0_90, %c128_91], %81 {strides = array<i32>} : memref<32x576xf32, #tpu.memory_space<vmem>>, vector<32x64xf32>,
    %c0_92 = arith.constant 0 : index
    %c1_93 = arith.constant 1 : index
    %c0_94 = arith.constant 0 : index
    %83 = vector.load %arg6[%c0_92, %c1_93, %c0_94] : memref<2x18x72xf32, #tpu.memory_space<vmem>>, vector<2x16x64xf32>
    %84 = vector.shape_cast %83 : vector<2x16x64xf32> to vector<32x64xf32>
    %c0_95 = arith.constant 0 : index
    %c192_96 = arith.constant 192 : index
    %85 = vector.load %arg7[%c0_95, %c192_96] : memref<32x576xf32, #tpu.memory_space<vmem>>, vector<32x64xf32>
    tpu.vector_store %arg7[%c0_95, %c192_96], %84 {strides = array<i32>} : memref<32x576xf32, #tpu.memory_space<vmem>>, vector<32x64xf32>,
    %c0_97 = arith.constant 0 : index
    %c1_98 = arith.constant 1 : index
    %c4_99 = arith.constant 4 : index
    %86 = vector.load %arg6[%c0_97, %c1_98, %c4_99] : memref<2x18x72xf32, #tpu.memory_space<vmem>>, vector<2x16x64xf32>
    %87 = vector.shape_cast %86 : vector<2x16x64xf32> to vector<32x64xf32>
    %c0_100 = arith.constant 0 : index
    %c256_101 = arith.constant 256 : index
    %88 = vector.load %arg7[%c0_100, %c256_101] : memref<32x576xf32, #tpu.memory_space<vmem>>, vector<32x64xf32>
    tpu.vector_store %arg7[%c0_100, %c256_101], %87 {strides = array<i32>} : memref<32x576xf32, #tpu.memory_space<vmem>>, vector<32x64xf32>,
    %c0_102 = arith.constant 0 : index
    %c1_103 = arith.constant 1 : index
    %c8_104 = arith.constant 8 : index
    %89 = vector.load %arg6[%c0_102, %c1_103, %c8_104] : memref<2x18x72xf32, #tpu.memory_space<vmem>>, vector<2x16x64xf32>
    %90 = vector.shape_cast %89 : vector<2x16x64xf32> to vector<32x64xf32>
    %c0_105 = arith.constant 0 : index
    %c320_106 = arith.constant 320 : index
    %91 = vector.load %arg7[%c0_105, %c320_106] : memref<32x576xf32, #tpu.memory_space<vmem>>, vector<32x64xf32>
    tpu.vector_store %arg7[%c0_105, %c320_106], %90 {strides = array<i32>} : memref<32x576xf32, #tpu.memory_space<vmem>>, vector<32x64xf32>,
    %c0_107 = arith.constant 0 : index
    %c2_108 = arith.constant 2 : index
    %c0_109 = arith.constant 0 : index
    %92 = vector.load %arg6[%c0_107, %c2_108, %c0_109] : memref<2x18x72xf32, #tpu.memory_space<vmem>>, vector<2x16x64xf32>
    %93 = vector.shape_cast %92 : vector<2x16x64xf32> to vector<32x64xf32>
    %c0_110 = arith.constant 0 : index
    %c384_111 = arith.constant 384 : index
    %94 = vector.load %arg7[%c0_110, %c384_111] : memref<32x576xf32, #tpu.memory_space<vmem>>, vector<32x64xf32>
    tpu.vector_store %arg7[%c0_110, %c384_111], %93 {strides = array<i32>} : memref<32x576xf32, #tpu.memory_space<vmem>>, vector<32x64xf32>,
    %c0_112 = arith.constant 0 : index
    %c2_113 = arith.constant 2 : index
    %c4_114 = arith.constant 4 : index
    %95 = vector.load %arg6[%c0_112, %c2_113, %c4_114] : memref<2x18x72xf32, #tpu.memory_space<vmem>>, vector<2x16x64xf32>
    %96 = vector.shape_cast %95 : vector<2x16x64xf32> to vector<32x64xf32>
    %c0_115 = arith.constant 0 : index
    %c448_116 = arith.constant 448 : index
    %97 = vector.load %arg7[%c0_115, %c448_116] : memref<32x576xf32, #tpu.memory_space<vmem>>, vector<32x64xf32>
    tpu.vector_store %arg7[%c0_115, %c448_116], %96 {strides = array<i32>} : memref<32x576xf32, #tpu.memory_space<vmem>>, vector<32x64xf32>,
    %c0_117 = arith.constant 0 : index
    %c2_118 = arith.constant 2 : index
    %c8_119 = arith.constant 8 : index
    %98 = vector.load %arg6[%c0_117, %c2_118, %c8_119] : memref<2x18x72xf32, #tpu.memory_space<vmem>>, vector<2x16x64xf32>
    %99 = vector.shape_cast %98 : vector<2x16x64xf32> to vector<32x64xf32>
    %c0_120 = arith.constant 0 : index
    %c512_121 = arith.constant 512 : index
    %100 = vector.load %arg7[%c0_120, %c512_121] : memref<32x576xf32, #tpu.memory_space<vmem>>, vector<32x64xf32>
    tpu.vector_store %arg7[%c0_120, %c512_121], %99 {strides = array<i32>} : memref<32x576xf32, #tpu.memory_space<vmem>>, vector<32x64xf32>,
    %c0_122 = arith.constant 0 : index
    %c0_123 = arith.constant 0 : index
    %101 = vector.load %arg7[%c0_122, %c0_123] : memref<32x576xf32, #tpu.memory_space<vmem>>, vector<32x576xf32>
    %c0_124 = arith.constant 0 : index
    %c0_125 = arith.constant 0 : index
    %102 = vector.load %arg2[%c0_124, %c0_125] : memref<576x64xf32, #tpu.memory_space<vmem>>, vector<576x64xf32>
    %cst_126 = arith.constant dense<0.000000e+00> : vector<32x64xf32>
    %103 = tpu.matmul %101, %102, %cst_126 {dimension_numbers = #tpu.dot_dimension_numbers<[1], [0], [0], [1], [0, 0, 1, 1], [], []>} : vector<32x576xf32>, vector<576x64xf32>, vector<32x64xf32> -> vector<32x64xf32>
    %cst_127 = arith.constant dense<0.000000e+00> : vector<64xf32>
    %104 = vector.multi_reduction <add>, %103, %cst_127 [0] : vector<32x64xf32> to vector<64xf32>
    %105 = vector.shape_cast %104 : vector<64xf32> to vector<1x64xf32>
    %106 = arith.mulf %103, %103 : vector<32x64xf32>
    %cst_128 = arith.constant dense<0.000000e+00> : vector<64xf32>
    %107 = vector.multi_reduction <add>, %106, %cst_128 [0] : vector<32x64xf32> to vector<64xf32>
    %108 = vector.shape_cast %107 : vector<64xf32> to vector<1x64xf32>
    %c0_129 = arith.constant 0 : index
    %c0_130 = arith.constant 0 : index
    %109 = vector.load %arg4[%c0_129, %c0_130] : memref<64x64xf32, #tpu.memory_space<vmem>>, vector<64x64xf32>
    %cst_131 = arith.constant dense<0.000000e+00> : vector<1x64xf32>
    %110 = tpu.matmul %105, %109, %cst_131 {dimension_numbers = #tpu.dot_dimension_numbers<[1], [0], [0], [1], [0, 0, 1, 1], [], []>} : vector<1x64xf32>, vector<64x64xf32>, vector<1x64xf32> -> vector<1x64xf32>
    %cst_132 = arith.constant 0.001953125 : f32
    %111 = vector.broadcast %cst_132 : f32 to vector<1x64xf32>
    %112 = arith.mulf %110, %111 : vector<1x64xf32>
    %c0_133 = arith.constant 0 : index
    %c0_134 = arith.constant 0 : index
    %113 = vector.load %arg4[%c0_133, %c0_134] : memref<64x64xf32, #tpu.memory_space<vmem>>, vector<64x64xf32>
    %cst_135 = arith.constant dense<0.000000e+00> : vector<1x64xf32>
    %114 = tpu.matmul %108, %113, %cst_135 {dimension_numbers = #tpu.dot_dimension_numbers<[1], [0], [0], [1], [0, 0, 1, 1], [], []>} : vector<1x64xf32>, vector<64x64xf32>, vector<1x64xf32> -> vector<1x64xf32>
    %cst_136 = arith.constant 0.001953125 : f32
    %115 = vector.broadcast %cst_136 : f32 to vector<1x64xf32>
    %116 = arith.mulf %114, %115 : vector<1x64xf32>
    %117 = arith.mulf %112, %112 : vector<1x64xf32>
    %118 = arith.subf %116, %117 : vector<1x64xf32>
    %cst_137 = arith.constant 9.99999974E-6 : f32
    %119 = vector.broadcast %cst_137 : f32 to vector<1x64xf32>
    %120 = arith.addf %118, %119 : vector<1x64xf32>
    %121 = math.rsqrt %120 : vector<1x64xf32>
    %122 = arith.mulf %11, %121 : vector<1x64xf32>
    %123 = arith.mulf %112, %122 : vector<1x64xf32>
    %124 = arith.subf %12, %123 : vector<1x64xf32>
    %125 = vector.broadcast %122 : vector<1x64xf32> to vector<32x64xf32>
    %126 = arith.mulf %103, %125 : vector<32x64xf32>
    %127 = vector.broadcast %124 : vector<1x64xf32> to vector<32x64xf32>
    %128 = arith.addf %126, %127 : vector<32x64xf32>
    %129 = arith.addf %128, %0 : vector<32x64xf32>
    %cst_138 = arith.constant 0.000000e+00 : f32
    %130 = vector.broadcast %cst_138 : f32 to vector<32x64xf32>
    %131 = arith.maximumf %129, %130 : vector<32x64xf32>
    %c0_139 = arith.constant 0 : index
    %c0_140 = arith.constant 0 : index
    %132 = vector.load %arg5[%c0_139, %c0_140] : memref<32x64xf32, #tpu.memory_space<vmem>>, vector<32x64xf32>
    tpu.vector_store %arg5[%c0_139, %c0_140], %131 {strides = array<i32>} : memref<32x64xf32, #tpu.memory_space<vmem>>, vector<32x64xf32>,
    return
  }
}

</mosaic_0001>

<bundles_post_ra>
// kernel: tile.9
= control target key start
LH: loop header
LB: loop body
LE: loop exit
PB: predicated region body
PF: predicated region fallthrough
CT: control target
= control target key end

     0   :  { %vm6_vm0 = vcmask 1043458   ;;  %s11_s6 = smov 3  ;;  %s14_s7 = smov 12  ;;  %vm8_vm1 = vcmask 31744   ;;  %vm20_vm2 = vcmask 523744   ;;  %vm32_vm3 = vcmask 490944   ;;  %s383_s0 = inlined_call_operand.vmem [shape: f32[4,16,4], index: 0, kind: input, shape index: {}]   ;;  %s384_s1 = inlined_call_operand.vmem [shape: f32[4,64], index: 1, kind: output, shape index: {}]  }
   0x1   :  { %v198_v0 = vld [vmem:[%s383_s0 + $0xf] ss:$16 sm:%s11_s6]   ;;  %s35_s12 = smov 3  ;;  %s38_s15 = smov 12  ;;  %vm44_vm4 = vcmask 458144   ;;  %vm56_vm5 = vcmask 425344  }
   0x2   :  { %v199_v1 = vld [vmem:[%s383_s0 + $0xf] ss:$16 sm:%s14_s7]   ;;  %v202_v3 = vld [vmem:[%s383_s0 + $0xd] ss:$16 sm:%s35_s12]   ;;  %s243_s16 = smov 60   ;;  %s23_s19 = smov 3 }
   0x3   :  { %v17_v2 = vsel %vm6_vm0, %v199_v1, %v198_v0  ;;  %v203_v4 = vld [vmem:[%s383_s0 + $0xd] ss:$16 sm:%s38_s15]   ;;  %s26_s20 = smov 12  ;;  %v200_v6 = vld [vmem:[%s383_s0 + $0xe] ss:$16 sm:%s23_s19]   ;;  %s47_s25 = smov 3 }
   0x4   :  { %18 = vrot.lane.b32.xlu0 %v17_v2, %s243_s16  ;;  %v41_v5 = vsel %vm6_vm0, %v203_v4, %v202_v3  ;;  %v201_v7 = vld [vmem:[%s383_s0 + $0xe] ss:$16 sm:%s26_s20]   ;;  %s244_s26 = smov 52   ;;  %s50_s29 = smov 12  ;;  %vm68_vm6 = vcmask 392544   ;;  %vm80_vm7 = vcmask 359744  }
   0x5   :  { %42 = vrot.lane.b32.xlu1 %v41_v5, %s244_s26  ;;  %v29_v8 = vsel %vm6_vm0, %v201_v7, %v200_v6  ;;  %v204_v9 = vld [vmem:[%s383_s0 + $0xc] ss:$16 sm:%s47_s25]   ;;  %s59_s3 = smov 3  ;;  %s62_s4 = smov 12  ;;  %vm92_vm8 = vcmask 326944   ;;  %vm104_vm9 = vcmask 294144  }
   0x6   :  { %v205_v10 = vld [vmem:[%s383_s0 + $0xc] ss:$16 sm:%s50_s29]   ;;  %s245_s5 = smov 56   ;;  %v206_v12 = vld [vmem:[%s383_s0 + $0xb] ss:$16 sm:%s59_s3]   ;;  %s71_s8 = smov 3 }
   0x7   :  { %v53_v11 = vsel %vm6_vm0, %v205_v10, %v204_v9  ;;  %v207_v13 = vld [vmem:[%s383_s0 + $0xb] ss:$16 sm:%s62_s4]   ;;  %v208_v14 = vld [vmem:[%s383_s0 + $0xa] ss:$16 sm:%s71_s8]   ;;  %s74_s13 = smov 12  ;;  %s246_s14 = smov 48  }
   0x8   :  { %30 = vrot.lane.b32.xlu0 %v29_v8, %s245_s5  ;;  %v65_v15 = vsel %vm6_vm0, %v207_v13, %v206_v12  ;;  %v209_v16 = vld [vmem:[%s383_s0 + $0xa] ss:$16 sm:%s74_s13]   ;;  %s83_s17 = smov 3  ;;  %s86_s18 = smov 12  ;;  %vm116_vm10 = vcmask 261344   ;;  %vm128_vm11 = vcmask 228544  }
   0x9   :  { %54 = vrot.lane.b32.xlu1 %v53_v11, %s246_s14  ;;  %v77_v17 = vsel %vm6_vm0, %v209_v16, %v208_v14  ;;  %v210_v18 = vld [vmem:[%s383_s0 + $0x9] ss:$16 sm:%s83_s17]   ;;  %s95_s23 = smov 3  ;;  %s247_s24 = smov 44   ;;  %vm140_vm12 = vcmask 195744   ;;  %vm152_vm13 = vcmask 162944  }
   0xa   :  { %v211_v19 = vld [vmem:[%s383_s0 + $0x9] ss:$16 sm:%s86_s18]   ;;  %v212_v20 = vld [vmem:[%s383_s0 + $0x8] ss:$16 sm:%s95_s23]   ;;  %s98_s27 = smov 12  ;;  %s107_s30 = smov 3 }
   0xb   :  { %v89_v21 = vsel %vm6_vm0, %v211_v19, %v210_v18  ;;  %v213_v22 = vld [vmem:[%s383_s0 + $0x8] ss:$16 sm:%s98_s27]   ;;  %s110_s2 = smov 12  ;;  %s248_s3 = smov 40   ;;  %v214_v23 = vld [vmem:[%s383_s0 + $0x7] ss:$16 sm:%s107_s30]  }
   0xc   :  { %66 = vrot.lane.b32.xlu0 %v65_v15, %s247_s24  ;;  %s119_s6 = smov 3  ;;  %v101_v24 = vsel %vm6_vm0, %v213_v22, %v212_v20  ;;  %v215_v25 = vld [vmem:[%s383_s0 + $0x7] ss:$16 sm:%s110_s2]   ;;  %s122_s11 = smov 12  ;;  %vm164_vm14 = vcmask 130144   ;;  %vm176_vm15 = vcmask 97344  }
   0xd   :  { %78 = vrot.lane.b32.xlu1 %v77_v17, %s248_s3  ;;  %v216_v26 = vld [vmem:[%s383_s0 + $0x6] ss:$16 sm:%s119_s6]   ;;  %s249_s12 = smov 36   ;;  %s131_s15 = smov 3  ;;  %v113_v28 = vsel %vm6_vm0, %v215_v25, %v214_v23 }
   0xe   :  { %v217_v27 = vld [vmem:[%s383_s0 + $0x6] ss:$16 sm:%s122_s11]   ;;  %s134_s16 = smov 12  ;;  %v218_v29 = vld [vmem:[%s383_s0 + $0x5] ss:$16 sm:%s131_s15]   ;;  %s143_s19 = smov 3 }
   0xf   :  { %s250_s20 = smov 32   ;;  %v219_v30 = vld [vmem:[%s383_s0 + $0x5] ss:$16 sm:%s134_s16]   ;;  %s146_s23 = smov 12  ;;  %v125_v31 = vsel %vm6_vm0, %v217_v27, %v216_v26  ;;  %v220_v32 = vld [vmem:[%s383_s0 + $0x4] ss:$16 sm:%s143_s19]  }
  0x10   :  { %90 = vrot.lane.b32.xlu0 %v89_v21, %s249_s12  ;;  %s155_s26 = smov 3  ;;  %s158_s27 = smov 12  ;;  %v221_v33 = vld [vmem:[%s383_s0 + $0x4] ss:$16 sm:%s146_s23]   ;;  %v137_v34 = vsel %vm6_vm0, %v219_v30, %v218_v29 }
  0x11   :  { %102 = vrot.lane.b32.xlu1 %v101_v24, %s250_s20  ;;  %s251_s28 = smov 28   ;;  %s167_s2 = smov 3  ;;  %v222_v35 = vld [vmem:[%s383_s0 + $0x3] ss:$16 sm:%s155_s26]   ;;  %v149_v37 = vsel %vm6_vm0, %v221_v33, %v220_v32 }
  0x12   :  { %s170_s5 = smov 12  ;;  %s252_s6 = smov 24   ;;  %v223_v36 = vld [vmem:[%s383_s0 + $0x3] ss:$16 sm:%s158_s27]   ;;  %v224_v38 = vld [vmem:[%s383_s0 + $0x2] ss:$16 sm:%s167_s2]  }
  0x13   :  { %s179_s9 = smov 3  ;;  %v225_v39 = vld [vmem:[%s383_s0 + $0x2] ss:$16 sm:%s170_s5]   ;;  %s182_s14 = smov 12  ;;  %v161_v41 = vsel %vm6_vm0, %v223_v36, %v222_v35 }
  0x14   :  { %114 = vrot.lane.b32.xlu0 %v113_v28, %s251_s28  ;;  %s2_s15 = smov 3  ;;  %s253_s16 = smov 20   ;;  %v226_v42 = vld [vmem:[%s383_s0 + $0x1] ss:$16 sm:%s179_s9]   ;;  %v173_v46 = vsel %vm6_vm0, %v225_v39, %v224_v38 }
  0x15   :  { %126 = vrot.lane.b32.xlu1 %v125_v31, %s252_s6  ;;  %v3_v40 = vld [vmem:[%s383_s0] ss:$16 sm:%s2_s15]   ;;  %s4_s19 = smov 12  ;;  %s254_s24 = smov 16  }
  0x16   :  { %v5_v43 = vld [vmem:[%s383_s0] ss:$16 sm:%s4_s19]   ;;  %v227_v44 = vld [vmem:[%s383_s0 + $0x1] ss:$16 sm:%s182_s14]   ;;  %s255_s0 = smov 12   ;;  %s256_s27 = smov 8  }
  0x17   :  { %v7_v45 = vsel %vm6_vm0, %v5_v43, %v3_v40  ;;  %v185_v47 = vsel %vm6_vm0, %v227_v44, %v226_v42  ;;  %s257_s28 = smov 4   ;;  %vm188_vm0 = vcmask 64544  }
  0x18   :  { %138 = vrot.lane.b32.xlu0 %v137_v34, %s253_s16  ;;  %9 = vst.msk [vmem:[#allocation0] sm:$0xf] %vm8_vm1, %v7_v45  }
  0x19   :  { %150 = vrot.lane.b32.xlu1 %v149_v37, %s254_s24 }
  0x1c   :  { %162 = vrot.lane.b32.xlu0 %v161_v41, %s255_s0 }
  0x1d   :  { %174 = vrot.lane.b32.xlu1 %v173_v46, %s256_s27 }
  0x20   :  { %186 = vrot.lane.b32.xlu0 %v185_v47, %s257_s28 }
  0x76   :  { %v19_v48 = vpop.permute.xlu0 %18  }
  0x77   :  { %21 = vst.msk [vmem:[#allocation0] sm:$0xf] %vm20_vm2, %v19_v48   ;;  %v43_v49 = vpop.permute.xlu1 %42  }
  0x7a   :  { %v31_v50 = vpop.permute.xlu0 %30  }
  0x7b   :  { %33 = vst.msk [vmem:[#allocation0] sm:$0xf] %vm32_vm3, %v31_v50   ;;  %v55_v51 = vpop.permute.xlu1 %54  }
  0x7c   :  { %45 = vst.msk [vmem:[#allocation0] sm:$0xf] %vm44_vm4, %v43_v49  }
  0x7d   :  { %57 = vst.msk [vmem:[#allocation0] sm:$0xf] %vm56_vm5, %v55_v51  }
  0x7e   :  { %v67_v52 = vpop.permute.xlu0 %66  }
  0x7f   :  { %69 = vst.msk [vmem:[#allocation0] sm:$0xf] %vm68_vm6, %v67_v52   ;;  %v79_v53 = vpop.permute.xlu1 %78  }
  0x80   :  { %81 = vst.msk [vmem:[#allocation0] sm:$0xf] %vm80_vm7, %v79_v53  }
  0x82   :  { %v91_v54 = vpop.permute.xlu0 %90  }
  0x83   :  { %93 = vst.msk [vmem:[#allocation0] sm:$0xf] %vm92_vm8, %v91_v54   ;;  %v103_v55 = vpop.permute.xlu1 %102  }
  0x84   :  { %105 = vst.msk [vmem:[#allocation0] sm:$0xf] %vm104_vm9, %v103_v55  }
  0x86   :  { %v115_v56 = vpop.permute.xlu0 %114  }
  0x87   :  { %117 = vst.msk [vmem:[#allocation0] sm:$0xf] %vm116_vm10, %v115_v56   ;;  %v127_v57 = vpop.permute.xlu1 %126  }
  0x88   :  { %129 = vst.msk [vmem:[#allocation0] sm:$0xf] %vm128_vm11, %v127_v57  }
  0x8a   :  { %v139_v58 = vpop.permute.xlu0 %138  }
  0x8b   :  { %141 = vst.msk [vmem:[#allocation0] sm:$0xf] %vm140_vm12, %v139_v58   ;;  %v151_v59 = vpop.permute.xlu1 %150  }
  0x8c   :  { %153 = vst.msk [vmem:[#allocation0] sm:$0xf] %vm152_vm13, %v151_v59  }
  0x8e   :  { %v163_v60 = vpop.permute.xlu0 %162  }
  0x8f   :  { %165 = vst.msk [vmem:[#allocation0] sm:$0xf] %vm164_vm14, %v163_v60   ;;  %v175_v61 = vpop.permute.xlu1 %174  }
  0x90   :  { %177 = vst.msk [vmem:[#allocation0] sm:$0xf] %vm176_vm15, %v175_v61  }
  0x92   :  { %v187_v62 = vpop.permute.xlu0 %186  }
  0x93   :  { %189 = vst.msk [vmem:[#allocation0] sm:$0xf] %vm188_vm0, %v187_v62  }
  0x9a   :  { %v194_v63 = vld [vmem:[#allocation0] sm:$0xf] }
  0x9b   :  { %197 = vst [vmem:[%s384_s1] sm:$0xf] %v194_v63 }

// kernel: residual_block.1
= control target key start
LH: loop header
LB: loop body
LE: loop exit
PB: predicated region body
PF: predicated region fallthrough
CT: control target
= control target key end

     0   :  { %vm24_vm0 = vcmask 581632   ;;  %vm29_vm1 = vcmask 31744   ;;  %vm37_vm2 = vcmask 589344   ;;  %v2000_v2 = vmov 0.0   ;;  %s2001_s22 = smov 4   ;;  %s2002_s12 = smov 64   ;;  %s2854_s0 = inlined_call_operand.vmem [shape: f32[32,64], index: 0, kind: input, shape index: {}]   ;;  %s2855_s1 = inlined_call_operand.vmem [shape: f32[576,64], index: 1, kind: input, shape index: {}]   ;;  %s2856_s4 = inlined_call_operand.vmem [shape: f32[64,64], index: 4, kind: input, shape index: {}]   ;;  %s2857_s3 = inlined_call_operand.vmem [shape: f32[4,64], index: 3, kind: input, shape index: {}]   ;;  %s2858_s2 = inlined_call_operand.vmem [shape: f32[576,64], index: 2, kind: input, shape index: {}]   ;;  %s2859_s5 = inlined_call_operand.vmem [shape: f32[32,64], index: 5, kind: output, shape index: {}]  }
   0x1   :  { %v20_v0 = vld [vmem:[%s2854_s0] sm:$0xff]  ;;  %v22_v1 = vld [vmem:[%s2854_s0 + $0x10] sm:$0xff]  ;;  %25 = vst.msk [vmem:[#allocation2] sm:$0x1] %vm24_vm0, %v2000_v2  ;;  %26 = vst.msk [vmem:[#allocation2 + $0x18] sm:$0x1] %vm24_vm0, %v2000_v2 }
   0x2   :  { %31 = vst.msk [vmem:[#allocation2 + $0x8] sm:$0xff] %vm29_vm1, %v2000_v2  ;;  %35 = vst.msk [vmem:[#allocation2 + $0x20] sm:$0xff] %vm29_vm1, %v2000_v2  ;;  %vm32_vm3 = vcmask 25600   ;;  %vm40_vm4 = vcmask 583200   ;;  %53 = vrot.lane.b32.xlu0 %v20_v0, %s2001_s22  ;;  %57 = vrot.lane.b32.xlu1 %v22_v1, %s2001_s22  ;;  %v21_v3 = vld [vmem:[%s2854_s0 + $0x8] sm:$0xff]  ;;  %v23_v4 = vld [vmem:[%s2854_s0 + $0x18] sm:$0xff] }
   0x3   :  { %27 = vst.msk [vmem:[#allocation2 + $0x11] sm:$0x1] %vm24_vm0, %v2000_v2  ;;  %28 = vst.msk [vmem:[#allocation2 + $0x29] sm:$0x1] %vm24_vm0, %v2000_v2  ;;  %v307_v5 = vld [vmem:[%s2855_s1 + $0xf8] sm:$0xff]  ;;  %v306_v7 = vld [vmem:[%s2855_s1 + $0xf0] sm:$0xff] }
   0x4   :  { %30 = vst.msk [vmem:[#allocation2] sm:$0xff] %vm29_vm1, %v2000_v2  ;;  %34 = vst.msk [vmem:[#allocation2 + $0x18] sm:$0xff] %vm29_vm1, %v2000_v2  ;;  %v291_v6 = vld [vmem:[%s2855_s1 + $0x78] sm:$0xff]  ;;  %1628 = vmatprep.subr.mxu0 %v307_v5  ;;  %v290_v8 = vld [vmem:[%s2855_s1 + $0x70] sm:$0xff]  ;;  %vm65_vm5 = vcmask 556064   ;;  %vm74_vm6 = vcmask 523264  }
   0x5   :  { %39 = vst.msk [vmem:[#allocation2 + $0x8] sm:$0xff] %vm37_vm2, %v2000_v2  ;;  %43 = vst.msk [vmem:[#allocation2 + $0x20] sm:$0xff] %vm37_vm2, %v2000_v2  ;;  %1629 = vmatpush3.msra.mxu0 %v291_v6  ;;  %v305_v9 = vld [vmem:[%s2855_s1 + $0xe8] sm:$0xff]  ;;  %v304_v11 = vld [vmem:[%s2855_s1 + $0xe0] sm:$0xff]  ;;  %s2003_s13 = smov 120   ;;  %s2004_s23 = smov 60  }
   0x6   :  { %33 = vst.msk [vmem:[#allocation2 + $0x10] sm:$0x3] %vm32_vm3, %v2000_v2  ;;  %36 = vst.msk [vmem:[#allocation2 + $0x28] sm:$0x3] %vm32_vm3, %v2000_v2  ;;  %55 = vrot.lane.b32.xlu0 %v21_v3, %s2001_s22  ;;  %59 = vrot.lane.b32.xlu1 %v23_v4, %s2001_s22  ;;  %v289_v10 = vld [vmem:[%s2855_s1 + $0x68] sm:$0xff]  ;;  %v339_v12 = vld [vmem:[%s2855_s1 + $0x1f8] sm:$0xff] }
   0x7   :  { %38 = vst.msk [vmem:[#allocation2] sm:$0xff] %vm37_vm2, %v2000_v2  ;;  %42 = vst.msk [vmem:[#allocation2 + $0x18] sm:$0xff] %vm37_vm2, %v2000_v2  ;;  %1630 = vmatprep.subr.mxu0 %v306_v7  ;;  %v288_v13 = vld [vmem:[%s2855_s1 + $0x60] sm:$0xff]  ;;  %1672 = vmatprep.subr.mxu1 %v339_v12  ;;  %v323_v14 = vld [vmem:[%s2855_s1 + $0x178] sm:$0xff]  ;;  %s2005_s15 = smov 124   ;;  %s2006_s16 = smov 56  }
   0x8   :  { %41 = vst.msk [vmem:[#allocation2 + $0x10] sm:$0x3] %vm40_vm4, %v2000_v2  ;;  %44 = vst.msk [vmem:[#allocation2 + $0x28] sm:$0x3] %vm40_vm4, %v2000_v2  ;;  %1631 = vmatpush3.msra.mxu0 %v290_v8  ;;  %v338_v15 = vld [vmem:[%s2855_s1 + $0x1f0] sm:$0xff]  ;;  %v303_v16 = vld [vmem:[%s2855_s1 + $0xd8] sm:$0xff]  ;;  %1673 = vmatpush3.msra.mxu1 %v323_v14 }
   0x9   :  { %1632 = vmatprep.subr.mxu0 %v305_v9  ;;  %v322_v17 = vld [vmem:[%s2855_s1 + $0x170] sm:$0xff]  ;;  %v287_v18 = vld [vmem:[%s2855_s1 + $0x58] sm:$0xff]  ;;  %1674 = vmatprep.subr.mxu1 %v338_v15  ;;  %v337_v19 = vld [vmem:[%s2855_s1 + $0x1e8] sm:$0xff]  ;;  %vm99_vm7 = vcmask 1048064   ;;  %vm2007_vm8 = vmmov 0  }
   0xa   :  { %1633 = vmatpush3.msra.mxu0 %v289_v10  ;;  %v321_v20 = vld [vmem:[%s2855_s1 + $0x168] sm:$0xff]  ;;  %v302_v21 = vld [vmem:[%s2855_s1 + $0xd0] sm:$0xff]  ;;  %1675 = vmatpush3.msra.mxu1 %v322_v17  ;;  %v336_v22 = vld [vmem:[%s2855_s1 + $0x1e0] sm:$0xff] }
   0xb   :  { %1634 = vmatprep.subr.mxu0 %v304_v11  ;;  %v286_v23 = vld [vmem:[%s2855_s1 + $0x50] sm:$0xff]  ;;  %1676 = vmatprep.subr.mxu1 %v337_v19  ;;  %v320_v24 = vld [vmem:[%s2855_s1 + $0x160] sm:$0xff]  ;;  %v301_v25 = vld [vmem:[%s2855_s1 + $0xc8] sm:$0xff] }
   0xc   :  { %1635 = vmatpush3.msra.mxu0 %v288_v13  ;;  %1677 = vmatpush3.msra.mxu1 %v321_v20  ;;  %v285_v26 = vld [vmem:[%s2855_s1 + $0x48] sm:$0xff]  ;;  %v300_v27 = vld [vmem:[%s2855_s1 + $0xc0] sm:$0xff]  ;;  %v299_v29 = vld [vmem:[%s2855_s1 + $0xb8] sm:$0xff] }
   0xd   :  { %1636 = vmatprep.subr.mxu0 %v303_v16  ;;  %1678 = vmatprep.subr.mxu1 %v336_v22  ;;  %v284_v28 = vld [vmem:[%s2855_s1 + $0x40] sm:$0xff]  ;;  %v283_v30 = vld [vmem:[%s2855_s1 + $0x38] sm:$0xff]  ;;  %v298_v31 = vld [vmem:[%s2855_s1 + $0xb0] sm:$0xff] }
   0xe   :  { %1637 = vmatpush3.msra.mxu0 %v287_v18  ;;  %1679 = vmatpush3.msra.mxu1 %v320_v24  ;;  %v282_v32 = vld [vmem:[%s2855_s1 + $0x30] sm:$0xff]  ;;  %v297_v33 = vld [vmem:[%s2855_s1 + $0xa8] sm:$0xff]  ;;  %v335_v34 = vld [vmem:[%s2855_s1 + $0x1d8] sm:$0xff] }
   0xf   :  { %1638 = vmatprep.subr.mxu0 %v302_v21  ;;  %1680 = vmatprep.subr.mxu1 %v335_v34  ;;  %v281_v35 = vld [vmem:[%s2855_s1 + $0x28] sm:$0xff]  ;;  %v319_v36 = vld [vmem:[%s2855_s1 + $0x158] sm:$0xff]  ;;  %v296_v37 = vld [vmem:[%s2855_s1 + $0xa0] sm:$0xff] }
  0x10   :  { %1639 = vmatpush3.msra.mxu0 %v286_v23  ;;  %1681 = vmatpush3.msra.mxu1 %v319_v36  ;;  %v334_v38 = vld [vmem:[%s2855_s1 + $0x1d0] sm:$0xff]  ;;  %v280_v39 = vld [vmem:[%s2855_s1 + $0x20] sm:$0xff]  ;;  %v295_v41 = vld [vmem:[%s2855_s1 + $0x98] sm:$0xff] }
  0x11   :  { %1640 = vmatprep.subr.mxu0 %v301_v25  ;;  %1682 = vmatprep.subr.mxu1 %v334_v38  ;;  %v318_v40 = vld [vmem:[%s2855_s1 + $0x150] sm:$0xff]  ;;  %v333_v42 = vld [vmem:[%s2855_s1 + $0x1c8] sm:$0xff]  ;;  %v279_v45 = vld [vmem:[%s2855_s1 + $0x18] sm:$0xff] }
  0x12   :  { %1641 = vmatpush3.msra.mxu0 %v285_v26  ;;  %1683 = vmatpush3.msra.mxu1 %v318_v40  ;;  %v317_v46 = vld [vmem:[%s2855_s1 + $0x148] sm:$0xff]  ;;  %v294_v47 = vld [vmem:[%s2855_s1 + $0x90] sm:$0xff]  ;;  %v332_v48 = vld [vmem:[%s2855_s1 + $0x1c0] sm:$0xff] }
  0x13   :  { %1642 = vmatprep.subr.mxu0 %v300_v27  ;;  %1684 = vmatprep.subr.mxu1 %v333_v42  ;;  %v278_v49 = vld [vmem:[%s2855_s1 + $0x10] sm:$0xff]  ;;  %v316_v50 = vld [vmem:[%s2855_s1 + $0x140] sm:$0xff]  ;;  %v293_v51 = vld [vmem:[%s2855_s1 + $0x88] sm:$0xff] }
  0x14   :  { %1643 = vmatpush3.msra.mxu0 %v284_v28  ;;  %1685 = vmatpush3.msra.mxu1 %v317_v46  ;;  %v331_v52 = vld [vmem:[%s2855_s1 + $0x1b8] sm:$0xff]  ;;  %v277_v55 = vld [vmem:[%s2855_s1 + $0x8] sm:$0xff]  ;;  %v292_v57 = vld [vmem:[%s2855_s1 + $0x80] sm:$0xff] }
  0x15   :  { %1644 = vmatprep.subr.mxu0 %v299_v29  ;;  %1686 = vmatprep.subr.mxu1 %v332_v48  ;;  %v315_v56 = vld [vmem:[%s2855_s1 + $0x138] sm:$0xff]  ;;  %v330_v58 = vld [vmem:[%s2855_s1 + $0x1b0] sm:$0xff]  ;;  %v276_v59 = vld [vmem:[%s2855_s1] sm:$0xff] }
  0x16   :  { %1645 = vmatpush3.msra.mxu0 %v283_v30  ;;  %1687 = vmatpush3.msra.mxu1 %v316_v50  ;;  %v314_v60 = vld [vmem:[%s2855_s1 + $0x130] sm:$0xff]  ;;  %v329_v61 = vld [vmem:[%s2855_s1 + $0x1a8] sm:$0xff]  ;;  %v328_v3 = vld [vmem:[%s2855_s1 + $0x1a0] sm:$0xff] }
  0x17   :  { %1646 = vmatprep.subr.mxu0 %v298_v31  ;;  %1688 = vmatprep.subr.mxu1 %v331_v52  ;;  %v313_v1 = vld [vmem:[%s2855_s1 + $0x128] sm:$0xff]  ;;  %v312_v4 = vld [vmem:[%s2855_s1 + $0x120] sm:$0xff]  ;;  %v327_v5 = vld [vmem:[%s2855_s1 + $0x198] sm:$0xff] }
  0x18   :  { %1647 = vmatpush3.msra.mxu0 %v282_v32  ;;  %1689 = vmatpush3.msra.mxu1 %v315_v56  ;;  %v311_v12 = vld [vmem:[%s2855_s1 + $0x118] sm:$0xff]  ;;  %v326_v13 = vld [vmem:[%s2855_s1 + $0x190] sm:$0xff]  ;;  %v325_v16 = vld [vmem:[%s2855_s1 + $0x188] sm:$0xff] }
  0x19   :  { %1648 = vmatprep.subr.mxu0 %v297_v33  ;;  %1690 = vmatprep.subr.mxu1 %v330_v58  ;;  %v310_v14 = vld [vmem:[%s2855_s1 + $0x110] sm:$0xff]  ;;  %v309_v17 = vld [vmem:[%s2855_s1 + $0x108] sm:$0xff]  ;;  %v324_v18 = vld [vmem:[%s2855_s1 + $0x180] sm:$0xff] }
  0x1a   :  { %1649 = vmatpush3.msra.mxu0 %v281_v35  ;;  %1691 = vmatpush3.msra.mxu1 %v314_v60  ;;  %v308_v19 = vld [vmem:[%s2855_s1 + $0x100] sm:$0xff]  ;;  %v347_v21 = vld [vmem:[%s2855_s1 + $0x238] sm:$0xff]  ;;  %v346_v33 = vld [vmem:[%s2855_s1 + $0x230] sm:$0xff] }
  0x1b   :  { %1650 = vmatprep.subr.mxu0 %v296_v37  ;;  %1692 = vmatprep.subr.mxu1 %v329_v61  ;;  %v345_v34 = vld [vmem:[%s2855_s1 + $0x228] sm:$0xff]  ;;  %v343_v40 = vld [vmem:[%s2855_s1 + $0x218] sm:$0xff] }
  0x1c   :  { %1651 = vmatpush3.msra.mxu0 %v280_v39  ;;  %1693 = vmatpush3.msra.mxu1 %v313_v1  ;;  %v344_v39 = vld [vmem:[%s2855_s1 + $0x220] sm:$0xff] }
  0x1d   :  { %1652 = vmatprep.subr.mxu0 %v295_v41  ;;  %1694 = vmatprep.subr.mxu1 %v328_v3 }
  0x1e   :  { %1653 = vmatpush3.msra.mxu0 %v279_v45  ;;  %1695 = vmatpush3.msra.mxu1 %v312_v4  ;;  %v341_v45 = vld [vmem:[%s2855_s1 + $0x208] sm:$0xff] }
  0x1f   :  { %1654 = vmatprep.subr.mxu0 %v294_v47  ;;  %1696 = vmatprep.subr.mxu1 %v327_v5 }
  0x20   :  { %1655 = vmatpush3.msra.mxu0 %v278_v49  ;;  %1697 = vmatpush3.msra.mxu1 %v311_v12  ;;  %v340_v49 = vld [vmem:[%s2855_s1 + $0x200] sm:$0xff] }
  0x21   :  { %1656 = vmatprep.subr.mxu0 %v293_v51  ;;  %1698 = vmatprep.subr.mxu1 %v326_v13 }
  0x22   :  { %1657 = vmatpush3.msra.mxu0 %v277_v55  ;;  %1699 = vmatpush3.msra.mxu1 %v310_v14 }
  0x23   :  { %1658 = vmatprep.subr.mxu0 %v292_v57  ;;  %1700 = vmatprep.subr.mxu1 %v325_v16  ;;  %v2379_v16 = vld [vmem:[%s2856_s4 + $0x30] sm:$0xff] }
  0x24   :  { %1659 = vmatpush3.msra.mxu0 %v276_v59  ;;  %1701 = vmatpush3.msra.mxu1 %v309_v17  ;;  %v2388_v17 = vld [vmem:[%s2856_s4 + $0x28] sm:$0xff] }
  0x25   :  { %1702 = vmatprep.subr.mxu1 %v324_v18  ;;  %1864 = vmatprep.subr.mxu0 %v347_v21  ;;  %v2397_v18 = vld [vmem:[%s2856_s4 + $0x20] sm:$0xff] }
  0x26   :  { %1703 = vmatpush3.msra.mxu1 %v308_v19  ;;  %v2406_v19 = vld [vmem:[%s2856_s4 + $0x18] sm:$0xff] }
  0x27   :  { %1886 = vmatprep.subr.mxu1 %v2000_v2 }
  0x74   :  { %v54_v43 = vpop.permute.xlu0 %53  ;;  %v58_v44 = vpop.permute.xlu1 %57 }
  0x75   :  { %66 = vst.msk [vmem:[#allocation2 + $0x1] sm:$0xff] %vm65_vm5, %v54_v43  ;;  %68 = vst.msk [vmem:[#allocation2 + $0x19] sm:$0xff] %vm65_vm5, %v58_v44  ;;  %v342_v44 = vld [vmem:[%s2855_s1 + $0x210] sm:$0xff] }
  0x78   :  { %v56_v53 = vpop.permute.xlu0 %55  ;;  %v60_v54 = vpop.permute.xlu1 %59 }
  0x79   :  { %67 = vst.msk [vmem:[#allocation2 + $0x9] sm:$0xff] %vm65_vm5, %v56_v53  ;;  %69 = vst.msk [vmem:[#allocation2 + $0x21] sm:$0xff] %vm65_vm5, %v60_v54 }
  0x7c   :  { %v128_v62 = vld [vmem:[#allocation2 + $0x1] sm:$0xff]  ;;  %v106_v0 = vld [vmem:[#allocation2 + $0x18] sm:$0xff] }
  0x7d   :  { %v104_v63 = vld [vmem:[#allocation2] sm:$0xff]  ;;  %136 = vrot.lane.b32.xlu1 %v128_v62, %s2002_s12  ;;  %77 = vst.msk [vmem:[#allocation3 + $0x50] sm:$0xff] %vm74_vm6, %v106_v0 }
  0x7e   :  { %112 = vrot.lane.b32.xlu0 %v104_v63, %s2003_s13  ;;  %75 = vst.msk [vmem:[#allocation3] sm:$0xff] %vm74_vm6, %v104_v63  ;;  %v130_v20 = vld [vmem:[#allocation2 + $0x19] sm:$0xff] }
  0x80   :  { %v105_v6 = vld [vmem:[#allocation2 + $0x8] sm:$0xff]  ;;  %v107_v9 = vld [vmem:[#allocation2 + $0x20] sm:$0xff] }
  0x81   :  { %v208_v7 = vld [vmem:[#allocation2 + $0x2] sm:$0xff]  ;;  %114 = vrot.lane.b32.xlu1 %v105_v6, %s2003_s13  ;;  %v209_v8 = vld [vmem:[#allocation2 + $0xa] sm:$0xff]  ;;  %76 = vst.msk [vmem:[#allocation3 + $0x28] sm:$0xff] %vm74_vm6, %v105_v6  ;;  %v210_v10 = vld [vmem:[#allocation2 + $0x1a] sm:$0xff] }
  0x82   :  { %87 = vrot.lane.b32.xlu0 %v104_v63, %s2004_s23  ;;  %204 = vst.msk [vmem:[#allocation3 + $0x18] sm:$0xff] %vm74_vm6, %v208_v7  ;;  %v211_v11 = vld [vmem:[#allocation2 + $0x22] sm:$0xff]  ;;  %205 = vst.msk [vmem:[#allocation3 + $0x40] sm:$0xff] %vm74_vm6, %v209_v8 }
  0x83   :  { %78 = vst.msk [vmem:[#allocation3 + $0x78] sm:$0xff] %vm74_vm6, %v107_v9  ;;  %206 = vst.msk [vmem:[#allocation3 + $0x68] sm:$0xff] %vm74_vm6, %v210_v10  ;;  %v129_v15 = vld [vmem:[#allocation2 + $0x9] sm:$0xff]  ;;  %v131_v22 = vld [vmem:[#allocation2 + $0x21] sm:$0xff] }
  0x84   :  { %207 = vst.msk [vmem:[#allocation3 + $0x90] sm:$0xff] %vm74_vm6, %v211_v11 }
  0x85   :  { %89 = vrot.lane.b32.xlu1 %v105_v6, %s2004_s23 }
  0x86   :  { %138 = vrot.lane.b32.xlu0 %v129_v15, %s2002_s12 }
  0x89   :  { %216 = vrot.lane.b32.xlu1 %v208_v7, %s2004_s23 }
  0x8a   :  { %160 = vrot.lane.b32.xlu0 %v128_v62, %s2005_s15 }
  0x8d   :  { %184 = vrot.lane.b32.xlu1 %v128_v62, %s2006_s16 }
  0x8e   :  { %116 = vrot.lane.b32.xlu0 %v106_v0, %s2003_s13 }
  0x91   :  { %91 = vrot.lane.b32.xlu1 %v106_v0, %s2004_s23 }
  0x92   :  { %140 = vrot.lane.b32.xlu0 %v130_v20, %s2002_s12 }
  0x95   :  { %218 = vrot.lane.b32.xlu1 %v209_v8, %s2004_s23 }
  0x96   :  { %162 = vrot.lane.b32.xlu0 %v129_v15, %s2005_s15 }
  0x99   :  { %186 = vrot.lane.b32.xlu1 %v129_v15, %s2006_s16  ;;  %v2371_v15 = vld [vmem:[%s2856_s4 + $0x38] sm:$0xff] }
  0x9a   :  { %118 = vrot.lane.b32.xlu0 %v107_v9, %s2003_s13 }
  0x9d   :  { %93 = vrot.lane.b32.xlu1 %v107_v9, %s2004_s23 }
  0x9e   :  { %142 = vrot.lane.b32.xlu0 %v131_v22, %s2002_s12 }
  0xa1   :  { %220 = vrot.lane.b32.xlu1 %v210_v10, %s2004_s23 }
  0xa2   :  { %164 = vrot.lane.b32.xlu0 %v130_v20, %s2005_s15 }
  0xa5   :  { %240 = vrot.lane.b32.xlu1 %v208_v7, %s2003_s13 }
  0xa6   :  { %188 = vrot.lane.b32.xlu0 %v130_v20, %s2006_s16  ;;  %v2415_v20 = vld [vmem:[%s2856_s4 + $0x10] sm:$0xff] }
  0xa9   :  { %166 = vrot.lane.b32.xlu1 %v131_v22, %s2005_s15 }
  0xaa   :  { %242 = vrot.lane.b32.xlu0 %v209_v8, %s2003_s13 }
  0xad   :  { %190 = vrot.lane.b32.xlu1 %v131_v22, %s2006_s16  ;;  %v2433_v22 = vld [vmem:[%s2856_s4] sm:$0xff] }
  0xae   :  { %222 = vrot.lane.b32.xlu0 %v211_v11, %s2004_s23 }
  0xb1   :  { %246 = vrot.lane.b32.xlu1 %v211_v11, %s2003_s13 }
  0xb2   :  { %244 = vrot.lane.b32.xlu0 %v210_v10, %s2003_s13 }
  0xef   :  { %v137_v23 = vpop.permute.xlu1 %136 }
  0xf0   :  { %v113_v24 = vpop.permute.xlu0 %112 }
  0xf1   :  { %124 = vst.msk [vmem:[#allocation3 + $0x8] sm:$0xff] %vm74_vm6, %v113_v24 }
  0xf2   :  { %148 = vst.msk [vmem:[#allocation3 + $0x8] sm:$0xff] %vm99_vm7, %v137_v23 }
  0xf3   :  { %v115_v25 = vpop.permute.xlu1 %114 }
  0xf4   :  { %v88_v26 = vpop.permute.xlu0 %87  ;;  %125 = vst.msk [vmem:[#allocation3 + $0x30] sm:$0xff] %vm74_vm6, %v115_v25 }
  0xf5   :  { %100 = vst.msk [vmem:[#allocation3] sm:$0xff] %vm99_vm7, %v88_v26 }
  0xf7   :  { %v90_v27 = vpop.permute.xlu1 %89 }
  0xf8   :  { %v139_v28 = vpop.permute.xlu0 %138  ;;  %101 = vst.msk [vmem:[#allocation3 + $0x28] sm:$0xff] %vm99_vm7, %v90_v27 }
  0xf9   :  { %149 = vst.msk [vmem:[#allocation3 + $0x30] sm:$0xff] %vm99_vm7, %v139_v28  ;;  %v257_v29 = vld [vmem:[#allocation3 + $0x8] sm:$0xff] }
  0xfa   :  { %424 = vmatprep.mubr.f32.mxu0 %v257_v29 }
  0xfb   :  { %v217_v30 = vpop.permute.xlu1 %216 }
  0xfc   :  { %v161_v31 = vpop.permute.xlu0 %160  ;;  %v256_v32 = vld [vmem:[#allocation3] sm:$0xff]  ;;  %228 = vst.msk [vmem:[#allocation3 + $0x18] sm:$0xff] %vm99_vm7, %v217_v30 }
  0xfd   :  { %172 = vst.msk [vmem:[#allocation3 + $0x10] sm:$0xff] %vm74_vm6, %v161_v31  ;;  %425 = vmatmul.mubr.f32.vlgmr.msra.gmra.mxu0 %v256_v32 }
  0xfe   :  { %1865 = vmatpush3.msra.mxu0 %v347_v21  ;;  %v2424_v21 = vld [vmem:[%s2856_s4 + $0x8] sm:$0xff] }
  0xff   :  { %1866 = vmatprep.subr.mxu0 %v346_v33  ;;  %v185_v35 = vpop.permute.xlu1 %184  ;;  %v261_v38 = vld [vmem:[#allocation3 + $0x28] sm:$0xff] }
 0x100   :  { %v117_v36 = vpop.permute.xlu0 %116  ;;  %v262_v37 = vld [vmem:[#allocation3 + $0x30] sm:$0xff]  ;;  %1867 = vmatpush3.msra.mxu0 %v346_v33  ;;  %196 = vst.msk [vmem:[#allocation3 + $0x10] sm:$0xff] %vm99_vm7, %v185_v35 }
 0x101   :  { %126 = vst.msk [vmem:[#allocation3 + $0x58] sm:$0xff] %vm74_vm6, %v117_v36  ;;  %429 = vmatprep.mubr.f32.mxu0 %v262_v37  ;;  %1868 = vmatprep.subr.mxu0 %v345_v34 }
 0x102   :  { %430 = vmatmul.mubr.f32.gmra.mxu0 %v261_v38 }
 0x103   :  { %1869 = vmatpush3.msra.mxu0 %v345_v34  ;;  %v92_v41 = vpop.permute.xlu1 %91  ;;  %v259_v43 = vld [vmem:[#allocation3 + $0x18] sm:$0xff] }
 0x104   :  { %v141_v42 = vpop.permute.xlu0 %140  ;;  %1870 = vmatprep.subr.mxu0 %v344_v39  ;;  %102 = vst.msk [vmem:[#allocation3 + $0x50] sm:$0xff] %vm99_vm7, %v92_v41  ;;  %509 = vmatprep.mubr.f32.mxu1 %v259_v43 }
 0x105   :  { %150 = vst.msk [vmem:[#allocation3 + $0x58] sm:$0xff] %vm99_vm7, %v141_v42  ;;  %1871 = vmatpush3.msra.mxu0 %v344_v39 }
 0x106   :  { %1872 = vmatprep.subr.mxu0 %v343_v40 }
 0x107   :  { %1873 = vmatpush3.msra.mxu0 %v343_v40  ;;  %v219_v46 = vpop.permute.xlu1 %218  ;;  %v258_v48 = vld [vmem:[#allocation3 + $0x10] sm:$0xff] }
 0x108   :  { %v163_v47 = vpop.permute.xlu0 %162  ;;  %1874 = vmatprep.subr.mxu0 %v342_v44  ;;  %229 = vst.msk [vmem:[#allocation3 + $0x40] sm:$0xff] %vm99_vm7, %v219_v46  ;;  %510 = vmatmul.mubr.f32.vlgmr.msra.gmra.mxu1 %v258_v48 }
 0x109   :  { %173 = vst.msk [vmem:[#allocation3 + $0x38] sm:$0xff] %vm74_vm6, %v163_v47  ;;  %1875 = vmatpush3.msra.mxu0 %v342_v44  ;;  %1887 = vmatpush3.msra.mxu1 %v2371_v15 }
 0x10a   :  { %1876 = vmatprep.subr.mxu0 %v341_v45  ;;  %1888 = vmatprep.subr.mxu1 %v2000_v2 }
 0x10b   :  { %1877 = vmatpush3.msra.mxu0 %v341_v45  ;;  %v187_v50 = vpop.permute.xlu1 %186  ;;  %v266_v53 = vld [vmem:[#allocation3 + $0x50] sm:$0xff]  ;;  %1889 = vmatpush3.msra.mxu1 %v2379_v16 }
 0x10c   :  { %v119_v51 = vpop.permute.xlu0 %118  ;;  %v267_v52 = vld [vmem:[#allocation3 + $0x58] sm:$0xff]  ;;  %1878 = vmatprep.subr.mxu0 %v340_v49  ;;  %197 = vst.msk [vmem:[#allocation3 + $0x38] sm:$0xff] %vm99_vm7, %v187_v50  ;;  %1890 = vmatprep.subr.mxu1 %v2000_v2 }
 0x10d   :  { %127 = vst.msk [vmem:[#allocation3 + $0x80] sm:$0xff] %vm74_vm6, %v119_v51  ;;  %434 = vmatprep.mubr.f32.mxu0 %v267_v52  ;;  %1879 = vmatpush3.msra.mxu0 %v340_v49 }
 0x10e   :  { %435 = vmatmul.mubr.f32.gmra.mxu0 %v266_v53  ;;  %1905 = vmatprep.subr.mxu0 %v2000_v2 }
 0x10f   :  { %v94_v54 = vpop.permute.xlu1 %93  ;;  %v264_v56 = vld [vmem:[#allocation3 + $0x40] sm:$0xff]  ;;  %1891 = vmatpush3.msra.mxu1 %v2388_v17 }
 0x110   :  { %v143_v55 = vpop.permute.xlu0 %142  ;;  %103 = vst.msk [vmem:[#allocation3 + $0x78] sm:$0xff] %vm99_vm7, %v94_v54  ;;  %514 = vmatprep.mubr.f32.mxu1 %v264_v56  ;;  %1892 = vmatprep.subr.mxu1 %v2000_v2 }
 0x111   :  { %151 = vst.msk [vmem:[#allocation3 + $0x80] sm:$0xff] %vm99_vm7, %v143_v55  ;;  %1893 = vmatpush3.msra.mxu1 %v2397_v18 }
 0x112   :  { %1894 = vmatprep.subr.mxu1 %v2000_v2 }
 0x113   :  { %v221_v57 = vpop.permute.xlu1 %220  ;;  %v263_v59 = vld [vmem:[#allocation3 + $0x38] sm:$0xff]  ;;  %1895 = vmatpush3.msra.mxu1 %v2406_v19 }
 0x114   :  { %v165_v58 = vpop.permute.xlu0 %164  ;;  %230 = vst.msk [vmem:[#allocation3 + $0x68] sm:$0xff] %vm99_vm7, %v221_v57  ;;  %515 = vmatmul.mubr.f32.gmra.mxu1 %v263_v59  ;;  %1896 = vmatprep.subr.mxu1 %v2000_v2 }
 0x115   :  { %174 = vst.msk [vmem:[#allocation3 + $0x60] sm:$0xff] %vm74_vm6, %v165_v58  ;;  %1897 = vmatpush3.msra.mxu1 %v2415_v20 }
 0x116   :  { %1898 = vmatprep.subr.mxu1 %v2000_v2 }
 0x117   :  { %v241_v60 = vpop.permute.xlu1 %240  ;;  %v271_v63 = vld [vmem:[#allocation3 + $0x78] sm:$0xff]  ;;  %1899 = vmatpush3.msra.mxu1 %v2424_v21 }
 0x118   :  { %v189_v61 = vpop.permute.xlu0 %188  ;;  %v272_v62 = vld [vmem:[#allocation3 + $0x80] sm:$0xff]  ;;  %252 = vst.msk [vmem:[#allocation3 + $0x20] sm:$0xff] %vm74_vm6, %v241_v60  ;;  %1900 = vmatprep.subr.mxu1 %v2000_v2 }
 0x119   :  { %198 = vst.msk [vmem:[#allocation3 + $0x60] sm:$0xff] %vm99_vm7, %v189_v61  ;;  %439 = vmatprep.mubr.f32.mxu0 %v272_v62  ;;  %1901 = vmatpush3.msra.mxu1 %v2433_v22 }
 0x11a   :  { %440 = vmatmul.mubr.f32.gmra.mxu0 %v271_v63 }
 0x11b   :  { %v167_v0 = vpop.permute.xlu1 %166  ;;  %v269_v3 = vld [vmem:[#allocation3 + $0x68] sm:$0xff] }
 0x11c   :  { %v243_v1 = vpop.permute.xlu0 %242  ;;  %175 = vst.msk [vmem:[#allocation3 + $0x88] sm:$0xff] %vm74_vm6, %v167_v0  ;;  %519 = vmatprep.mubr.f32.mxu1 %v269_v3 }
 0x11d   :  { %253 = vst.msk [vmem:[#allocation3 + $0x48] sm:$0xff] %vm74_vm6, %v243_v1 }
 0x11f   :  { %v191_v4 = vpop.permute.xlu1 %190  ;;  %v260_v7 = vld [vmem:[#allocation3 + $0x20] sm:$0xff] }
 0x120   :  { %v223_v5 = vpop.permute.xlu0 %222  ;;  %v268_v6 = vld [vmem:[#allocation3 + $0x60] sm:$0xff]  ;;  %199 = vst.msk [vmem:[#allocation3 + $0x88] sm:$0xff] %vm99_vm7, %v191_v4  ;;  %1880 = vmatprep.mubr.msk.f32.mxu0 %vm74_vm6, %v260_v7 }
 0x121   :  { %231 = vst.msk [vmem:[#allocation3 + $0x90] sm:$0xff] %vm99_vm7, %v223_v5  ;;  %520 = vmatmul.mubr.f32.gmra.mxu1 %v268_v6 }
 0x123   :  { %v247_v8 = vpop.permute.xlu1 %246 }
 0x124   :  { %v245_v9 = vpop.permute.xlu0 %244  ;;  %v265_v10 = vld [vmem:[#allocation3 + $0x48] sm:$0xff]  ;;  %255 = vst.msk [vmem:[#allocation3 + $0x98] sm:$0xff] %vm74_vm6, %v247_v8 }
 0x125   :  { %254 = vst.msk [vmem:[#allocation3 + $0x70] sm:$0xff] %vm74_vm6, %v245_v9  ;;  %1881 = vmatmul.mubr.msk.f32.vlgmr.msra.gmra.mxu0 %vm74_vm6, %v265_v10 }
 0x126   :  { %1906 = vmatpush3.msra.mxu0 %v2371_v15 }
 0x127   :  { %v273_v12 = vld [vmem:[#allocation3 + $0x88] sm:$0xff]  ;;  %1907 = vmatprep.subr.mxu0 %v2000_v2 }
 0x128   :  { %v274_v11 = vld [vmem:[#allocation3 + $0x90] sm:$0xff]  ;;  %1908 = vmatpush3.msra.mxu0 %v2379_v16 }
 0x129   :  { %524 = vmatprep.mubr.f32.mxu1 %v274_v11  ;;  %1909 = vmatprep.subr.mxu0 %v2000_v2 }
 0x12a   :  { %525 = vmatmul.mubr.f32.gmra.mxu1 %v273_v12  ;;  %1910 = vmatpush3.msra.mxu0 %v2388_v17 }
 0x12b   :  { %v275_v14 = vld [vmem:[#allocation3 + $0x98] sm:$0xff]  ;;  %1911 = vmatprep.subr.mxu0 %v2000_v2  ;;  %1902 = vmatprep.mubr.msk.f32.mxu1 %vm2007_vm8, %v2000_v2 }
 0x12c   :  { %v270_v13 = vld [vmem:[#allocation3 + $0x70] sm:$0xff]  ;;  %1912 = vmatpush3.msra.mxu0 %v2397_v18 }
 0x12d   :  { %1883 = vmatprep.mubr.msk.f32.mxu0 %vm74_vm6, %v270_v13  ;;  %1913 = vmatprep.subr.mxu0 %v2000_v2 }
 0x12e   :  { %1884 = vmatmul.mubr.msk.f32.gmra.mxu0 %vm74_vm6, %v275_v14 }
 0x12f   :  { %1914 = vmatpush3.msra.mxu0 %v2406_v19  ;;  %1921 = vmatprep.mubr.msk.f32.mxu0 %vm2007_vm8, %v2000_v2 }
 0x130   :  { %1915 = vmatprep.subr.mxu0 %v2000_v2 }
 0x131   :  { %1916 = vmatpush3.msra.mxu0 %v2415_v20 }
 0x132   :  { %1917 = vmatprep.subr.mxu0 %v2000_v2 }
 0x133   :  { %1918 = vmatpush3.msra.mxu0 %v2424_v21 }
 0x134   :  { %1919 = vmatprep.subr.mxu0 %v2000_v2 }
 0x135   :  { %1920 = vmatpush3.msra.mxu0 %v2433_v22 }
 0x1bd   :  { %v1660_v23 = vpop.f32.mrf.mxu0 }
 0x1bf   :  { %v1661_v24 = vpop.f32.mrf.mxu0 }
 0x1c0   :  { %v1662_v37 = vadd.f32 %v1661_v24, %v1660_v23 }
 0x1c2   :  { %v1663_v25 = vpop.f32.mrf.mxu0 }
 0x1c4   :  { %v1664_v26 = vpop.f32.mrf.mxu0 }
 0x1c5   :  { %v1665_v40 = vadd.f32 %v1664_v26, %v1663_v25 }
 0x1c8   :  { %v1704_v27 = vpop.f32.mrf.mxu1 }
 0x1ca   :  { %v1705_v29 = vpop.f32.mrf.mxu1 }
 0x1cb   :  { %v1706_v34 = vadd.f32 %v1705_v29, %v1704_v27 }
 0x1cd   :  { %v512_v41 = vadd.f32 %v1706_v34, %v1662_v37 }
 0x1ce   :  { %v1666_v28 = vpop.f32.mrf.mxu0 }
 0x1d0   :  { %v1667_v30 = vpop.f32.mrf.mxu0 }
 0x1d1   :  { %v1668_v50 = vadd.f32 %v1667_v30, %v1666_v28 }
 0x1d4   :  { %v1707_v31 = vpop.f32.mrf.mxu1 }
 0x1d6   :  { %v1708_v33 = vpop.f32.mrf.mxu1 }
 0x1d7   :  { %v1709_v38 = vadd.f32 %v1708_v33, %v1707_v31 }
 0x1d9   :  { %v517_v44 = vadd.f32 %v1709_v38, %v1665_v40 }
 0x1da   :  { %v1669_v32 = vpop.f32.mrf.mxu0 }
 0x1dc   :  { %v1670_v35 = vpop.f32.mrf.mxu0 }
 0x1dd   :  { %v1671_v51 = vadd.f32 %v1670_v35, %v1669_v32 }
 0x1e1   :  { %v1710_v36 = vpop.f32.mrf.mxu1 }
 0x1e3   :  { %v1711_v43 = vpop.f32.mrf.mxu1 }
 0x1e4   :  { %v1712_v47 = vadd.f32 %v1711_v43, %v1710_v36  ;;  %v808_v43 = vlaneseq }
 0x1e5   :  { %v1882_v39 = vpop.f32.mrf.mxu0 }
 0x1e6   :  { %v2444_v48 = vadd.f32 %v1882_v39, %v517_v44  ;;  %v522_v58 = vadd.f32 %v1712_v47, %v1668_v50  ;;  %v809_v44 = vshrl.u32 %v808_v43, 7  ;;  %v1072_v43 = vld [vmem:[%s2858_s2 + $0xa0] sm:$0xff] }
 0x1e7   :  { %v596_v42 = vpop.f32.mrf.mxu0 }
 0x1e8   :  { %v2442_v45 = vadd.f32 %v596_v42, %v512_v41  ;;  %v629_v55 = vmul.f32 %v2444_v48, %v2444_v48  ;;  %v616_v60 = vsel %vm74_vm6, %v2444_v48, 0.0  ;;  %v2465_v47 = vsub.s32 0, %v809_v44  ;;  %v1110_v44 = vld [vmem:[%s2858_s2 + $0x1d0] sm:$0xff] }
 0x1ea   :  { %v1713_v46 = vpop.f32.mrf.mxu1  ;;  %v628_v52 = vmul.f32 %v2442_v45, %v2442_v45  ;;  %v615_v56 = vsel %vm74_vm6, %v2442_v45, 0.0  ;;  %v633_v1 = vsel %vm74_vm6, %v629_v55, 0.0 }
 0x1eb   :  { %v617_v0 = vadd.f32 %v616_v60, %v615_v56 }
 0x1ec   :  { %v1714_v49 = vpop.f32.mrf.mxu1  ;;  %v632_v61 = vsel %vm74_vm6, %v628_v52, 0.0 }
 0x1ed   :  { %v1715_v53 = vadd.f32 %v1714_v49, %v1713_v46  ;;  %v634_v6 = vadd.f32 %v633_v1, %v632_v61  ;;  %v45_v46 = vld [vmem:[%s2857_s3] sm:$0x1] }
 0x1ee   :  { %v1885_v54 = vpop.f32.mrf.mxu0 }
 0x1ef   :  { %v527_v57 = vadd.f32 %v1715_v53, %v1671_v51  ;;  %v46_v51 = vld [vmem:[%s2857_s3 + $0x1] sm:$0x1] }
 0x1f0   :  { %v606_v59 = vpop.f32.mrf.mxu0 }
 0x1f1   :  { %v612_v62 = vadd.f32 %v1885_v54, %v527_v57  ;;  %v607_v63 = vadd.f32 %v606_v59, %v522_v58 }
 0x1f3   :  { %v631_v3 = vmul.f32 %v612_v62, %v612_v62  ;;  %v618_v4 = vsel %vm74_vm6, %v607_v63, 0.0  ;;  %v630_v5 = vmul.f32 %v607_v63, %v607_v63  ;;  %v620_v8 = vsel %vm74_vm6, %v612_v62, 0.0 }
 0x1f4   :  { %v619_v7 = vadd.f32 %v618_v4, %v617_v0 }
 0x1f5   :  { %v635_v9 = vsel %vm74_vm6, %v630_v5, 0.0  ;;  %v637_v12 = vsel %vm74_vm6, %v631_v3, 0.0 }
 0x1f6   :  { %v621_v10 = vadd.f32 %v620_v8, %v619_v7  ;;  %v636_v11 = vadd.f32 %v635_v9, %v634_v6  ;;  %v1081_v7 = vld [vmem:[%s2858_s2 + $0xe8] sm:$0xff]  ;;  %v1080_v9 = vld [vmem:[%s2858_s2 + $0xe0] sm:$0xff] }
 0x1f7   :  { %v1065_v8 = vld [vmem:[%s2858_s2 + $0x68] sm:$0xff] }
 0x1f8   :  { %v622_v13 = vrot.slane %v621_v10, 4  ;;  %v638_v14 = vadd.f32 %v637_v12, %v636_v11  ;;  %v1064_v11 = vld [vmem:[%s2858_s2 + $0x60] sm:$0xff]  ;;  %v1099_v12 = vld [vmem:[%s2858_s2 + $0x178] sm:$0xff] }
 0x1fa   :  { %v623_v23 = vadd.f32 %v622_v13, %v621_v10  ;;  %v639_v24 = vrot.slane %v638_v14, 4  ;;  %v1115_v10 = vld [vmem:[%s2858_s2 + $0x1f8] sm:$0xff]  ;;  %v1114_v13 = vld [vmem:[%s2858_s2 + $0x1f0] sm:$0xff] }
 0x1fb   :  { %1790 = vmatprep.subr.mxu0 %v1115_v10  ;;  %v1105_v10 = vld [vmem:[%s2858_s2 + $0x1a8] sm:$0xff] }
 0x1fc   :  { %v624_v25 = vrot.slane %v623_v23, 2  ;;  %v640_v26 = vadd.f32 %v639_v24, %v638_v14  ;;  %v1079_v14 = vld [vmem:[%s2858_s2 + $0xd8] sm:$0xff] }
 0x1fd   :  { %v1063_v24 = vld [vmem:[%s2858_s2 + $0x58] sm:$0xff] }
 0x1fe   :  { %v625_v27 = vadd.f32 %v624_v25, %v623_v23  ;;  %v641_v28 = vrot.slane %v640_v26, 2  ;;  %v1098_v23 = vld [vmem:[%s2858_s2 + $0x170] sm:$0xff]  ;;  %v1113_v25 = vld [vmem:[%s2858_s2 + $0x1e8] sm:$0xff] }
 0x200   :  { %v626_v29 = vrot.slane %v625_v27, 1  ;;  %v642_v30 = vadd.f32 %v641_v28, %v640_v26  ;;  %v1097_v26 = vld [vmem:[%s2858_s2 + $0x168] sm:$0xff]  ;;  %v1112_v28 = vld [vmem:[%s2858_s2 + $0x1e0] sm:$0xff] }
 0x202   :  { %v627_v31 = vadd.f32 %v626_v29, %v625_v27  ;;  %v643_v32 = vrot.slane %v642_v30, 1  ;;  %v1078_v27 = vld [vmem:[%s2858_s2 + $0xd0] sm:$0xff] }
 0x203   :  { %v1062_v29 = vld [vmem:[%s2858_s2 + $0x50] sm:$0xff] }
 0x204   :  { %v644_v33 = vadd.f32 %v643_v32, %v642_v30  ;;  %1903 = vmatmul.mubr.msk.f32.vlgmr.msra.gmra.mxu1 %vm74_vm6, %v627_v31  ;;  %v1096_v30 = vld [vmem:[%s2858_s2 + $0x160] sm:$0xff]  ;;  %v1077_v31 = vld [vmem:[%s2858_s2 + $0xc8] sm:$0xff] }
 0x205   :  { %v1061_v32 = vld [vmem:[%s2858_s2 + $0x48] sm:$0xff] }
 0x206   :  { %1922 = vmatmul.mubr.msk.f32.vlgmr.msra.gmra.mxu0 %vm74_vm6, %v644_v33  ;;  %v1076_v33 = vld [vmem:[%s2858_s2 + $0xc0] sm:$0xff] }
 0x207   :  { %1791 = vmatpush3.msra.mxu0 %v1099_v12  ;;  %v1104_v12 = vld [vmem:[%s2858_s2 + $0x1a0] sm:$0xff] }
 0x208   :  { %1792 = vmatprep.subr.mxu0 %v1114_v13 }
 0x209   :  { %1793 = vmatpush3.msra.mxu0 %v1098_v23  ;;  %v1088_v23 = vld [vmem:[%s2858_s2 + $0x120] sm:$0xff] }
 0x20a   :  { %1794 = vmatprep.subr.mxu0 %v1113_v25 }
 0x20b   :  { %1795 = vmatpush3.msra.mxu0 %v1097_v26  ;;  %v1103_v26 = vld [vmem:[%s2858_s2 + $0x198] sm:$0xff] }
 0x20c   :  { %1796 = vmatprep.subr.mxu0 %v1112_v28 }
 0x20d   :  { %1797 = vmatpush3.msra.mxu0 %v1096_v30  ;;  %v1086_v30 = vld [vmem:[%s2858_s2 + $0x110] sm:$0xff] }
 0x2c4   :  { %v722_v34 = vpop.f32.mrf.mxu1 }
 0x2c5   :  { %v726_v35 = vmul.f32 0.001953125, %v722_v34  ;;  %v1060_v34 = vld [vmem:[%s2858_s2 + $0x40] sm:$0xff] }
 0x2c6   :  { %v1904_v36 = vpop.f32.mrf.mxu1  ;;  %v796_v37 = vpop.f32.mrf.mxu0 }
 0x2c7   :  { %v801_v38 = vmul.f32 %v726_v35, %v726_v35  ;;  %v800_v39 = vmul.f32 0.001953125, %v796_v37  ;;  %v1059_v36 = vld [vmem:[%s2858_s2 + $0x38] sm:$0xff]  ;;  %v1074_v37 = vld [vmem:[%s2858_s2 + $0xb0] sm:$0xff] }
 0x2c8   :  { %v1923_v40 = vpop.f32.mrf.mxu0 }
 0x2c9   :  { %v802_v41 = vsub.f32 %v800_v39, %v801_v38  ;;  %v1058_v38 = vld [vmem:[%s2858_s2 + $0x30] sm:$0xff]  ;;  %v1073_v39 = vld [vmem:[%s2858_s2 + $0xa8] sm:$0xff]  ;;  %v1111_v40 = vld [vmem:[%s2858_s2 + $0x1d8] sm:$0xff] }
 0x2ca   :  { %1798 = vmatprep.subr.mxu0 %v1111_v40 }
 0x2cb   :  { %v803_v42 = vadd.f32 1e-05, %v802_v41  ;;  %v1057_v41 = vld [vmem:[%s2858_s2 + $0x28] sm:$0xff] }
 0x2cd   :  { %1992 = vrsqrt.f32 %v803_v42  ;;  %v1095_v42 = vld [vmem:[%s2858_s2 + $0x158] sm:$0xff] }
 0x2ce   :  { %1799 = vmatpush3.msra.mxu0 %v1095_v42 }
 0x2cf   :  { %1800 = vmatprep.subr.mxu0 %v1110_v44 }
 0x2da   :  { %v1993_v49 = vpop.eup %1992 }
 0x2db   :  { %v805_v50 = vmul.f32 %v1993_v49, %v45_v46  ;;  %v1056_v46 = vld [vmem:[%s2858_s2 + $0x20] sm:$0xff]  ;;  %v1094_v49 = vld [vmem:[%s2858_s2 + $0x150] sm:$0xff] }
 0x2dc   :  { %1801 = vmatpush3.msra.mxu0 %v1094_v49 }
 0x2dd   :  { %v806_v52 = vmul.f32 %v805_v50, %v726_v35  ;;  %v811_v53 = vrot.slane %v805_v50, %v2465_v47  ;;  %v1075_v35 = vld [vmem:[%s2858_s2 + $0xb8] sm:$0xff] }
 0x2df   :  { %v807_v54 = vsub.f32 %v46_v51, %v806_v52  ;;  %v813_v55 = vmul.f32 %v811_v53, %v2444_v48  ;;  %v812_v57 = vmul.f32 %v811_v53, %v2442_v45  ;;  %v815_v60 = vmul.f32 %v811_v53, %v612_v62  ;;  %v1083_v45 = vld [vmem:[%s2858_s2 + $0xf8] sm:$0xff]  ;;  %v1082_v62 = vld [vmem:[%s2858_s2 + $0xf0] sm:$0xff] }
 0x2e0   :  { %v814_v61 = vmul.f32 %v811_v53, %v607_v63  ;;  %v1067_v48 = vld [vmem:[%s2858_s2 + $0x78] sm:$0xff]  ;;  %1746 = vmatprep.subr.mxu1 %v1083_v45  ;;  %v1066_v63 = vld [vmem:[%s2858_s2 + $0x70] sm:$0xff]  ;;  %v1109_v53 = vld [vmem:[%s2858_s2 + $0x1c8] sm:$0xff] }
 0x2e1   :  { %v819_v56 = vrot.slane %v807_v54, %v2465_v47  ;;  %1747 = vmatpush3.msra.mxu1 %v1067_v48  ;;  %v1071_v52 = vld [vmem:[%s2858_s2 + $0x98] sm:$0xff]  ;;  %1802 = vmatprep.subr.mxu0 %v1109_v53  ;;  %v1052_v45 = vld [vmem:[%s2858_s2] sm:$0xff]  ;;  %v1090_v48 = vld [vmem:[%s2858_s2 + $0x130] sm:$0xff] }
 0x2e2   :  { %1748 = vmatprep.subr.mxu1 %v1082_v62  ;;  %v1055_v54 = vld [vmem:[%s2858_s2 + $0x18] sm:$0xff] }
 0x2e3   :  { %v821_v58 = vadd.f32 %v819_v56, %v813_v55  ;;  %v820_v59 = vadd.f32 %v819_v56, %v812_v57  ;;  %v823_v3 = vadd.f32 %v819_v56, %v815_v60  ;;  %v822_v4 = vadd.f32 %v819_v56, %v814_v61  ;;  %1749 = vmatpush3.msra.mxu1 %v1066_v63  ;;  %v1093_v55 = vld [vmem:[%s2858_s2 + $0x148] sm:$0xff]  ;;  %v1070_v56 = vld [vmem:[%s2858_s2 + $0x90] sm:$0xff]  ;;  %v1108_v57 = vld [vmem:[%s2858_s2 + $0x1c0] sm:$0xff] }
 0x2e4   :  { %1750 = vmatprep.subr.mxu1 %v1081_v7  ;;  %1803 = vmatpush3.msra.mxu0 %v1093_v55 }
 0x2e5   :  { %v825_v0 = vmax.f32 %v821_v58, 0.0  ;;  %v824_v1 = vmax.f32 %v820_v59, 0.0  ;;  %v827_v5 = vmax.f32 %v823_v3, 0.0  ;;  %v826_v6 = vmax.f32 %v822_v4, 0.0  ;;  %1751 = vmatpush3.msra.mxu1 %v1065_v8  ;;  %v1054_v58 = vld [vmem:[%s2858_s2 + $0x10] sm:$0xff]  ;;  %v1092_v59 = vld [vmem:[%s2858_s2 + $0x140] sm:$0xff]  ;;  %1804 = vmatprep.subr.mxu0 %v1108_v57 }
 0x2e6   :  { %1752 = vmatprep.subr.mxu1 %v1080_v9  ;;  %1805 = vmatpush3.msra.mxu0 %v1092_v59  ;;  %v1053_v3 = vld [vmem:[%s2858_s2 + $0x8] sm:$0xff]  ;;  %v1091_v4 = vld [vmem:[%s2858_s2 + $0x138] sm:$0xff]  ;;  %v1120_v57 = vld [vmem:[%s2858_s2 + $0x220] sm:$0xff] }
 0x2e7   :  { %834 = vrot.lane.b32.xlu1 %v825_v0, %s2001_s22  ;;  %832 = vrot.lane.b32.xlu0 %v824_v1, %s2001_s22  ;;  %v1069_v0 = vld [vmem:[%s2858_s2 + $0x88] sm:$0xff]  ;;  %v1107_v1 = vld [vmem:[%s2858_s2 + $0x1b8] sm:$0xff] }
 0x2e8   :  { %1753 = vmatpush3.msra.mxu1 %v1064_v11  ;;  %1806 = vmatprep.subr.mxu0 %v1107_v1  ;;  %v1089_v11 = vld [vmem:[%s2858_s2 + $0x128] sm:$0xff] }
 0x2e9   :  { %1754 = vmatprep.subr.mxu1 %v1079_v14  ;;  %1807 = vmatpush3.msra.mxu0 %v1091_v4  ;;  %v1117_v1 = vld [vmem:[%s2858_s2 + $0x208] sm:$0xff] }
 0x2ea   :  { %1755 = vmatpush3.msra.mxu1 %v1063_v24 }
 0x2eb   :  { %838 = vrot.lane.b32.xlu1 %v827_v5, %s2001_s22  ;;  %836 = vrot.lane.b32.xlu0 %v826_v6, %s2001_s22  ;;  %v1068_v5 = vld [vmem:[%s2858_s2 + $0x80] sm:$0xff]  ;;  %v1106_v6 = vld [vmem:[%s2858_s2 + $0x1b0] sm:$0xff] }
 0x2ec   :  { %1756 = vmatprep.subr.mxu1 %v1078_v27  ;;  %1808 = vmatprep.subr.mxu0 %v1106_v6  ;;  %v1087_v27 = vld [vmem:[%s2858_s2 + $0x118] sm:$0xff]  ;;  %v1116_v6 = vld [vmem:[%s2858_s2 + $0x200] sm:$0xff] }
 0x2ed   :  { %1757 = vmatpush3.msra.mxu1 %v1062_v29  ;;  %1809 = vmatpush3.msra.mxu0 %v1090_v48  ;;  %v1102_v29 = vld [vmem:[%s2858_s2 + $0x190] sm:$0xff] }
 0x2ee   :  { %1758 = vmatprep.subr.mxu1 %v1077_v31  ;;  %1810 = vmatprep.subr.mxu0 %v1105_v10  ;;  %v1101_v31 = vld [vmem:[%s2858_s2 + $0x188] sm:$0xff] }
 0x2ef   :  { %1759 = vmatpush3.msra.mxu1 %v1061_v32  ;;  %1811 = vmatpush3.msra.mxu0 %v1089_v11  ;;  %v1085_v32 = vld [vmem:[%s2858_s2 + $0x108] sm:$0xff] }
 0x2f0   :  { %1760 = vmatprep.subr.mxu1 %v1076_v33  ;;  %1812 = vmatprep.subr.mxu0 %v1104_v12  ;;  %v1100_v33 = vld [vmem:[%s2858_s2 + $0x180] sm:$0xff] }
 0x2f1   :  { %1761 = vmatpush3.msra.mxu1 %v1060_v34  ;;  %1813 = vmatpush3.msra.mxu0 %v1088_v23  ;;  %v1084_v34 = vld [vmem:[%s2858_s2 + $0x100] sm:$0xff] }
 0x2f2   :  { %1762 = vmatprep.subr.mxu1 %v1075_v35  ;;  %1814 = vmatprep.subr.mxu0 %v1103_v26 }
 0x2f3   :  { %1763 = vmatpush3.msra.mxu1 %v1059_v36  ;;  %1815 = vmatpush3.msra.mxu0 %v1087_v27  ;;  %v1123_v36 = vld [vmem:[%s2858_s2 + $0x238] sm:$0xff] }
 0x2f4   :  { %1764 = vmatprep.subr.mxu1 %v1074_v37  ;;  %1816 = vmatprep.subr.mxu0 %v1102_v29 }
 0x2f5   :  { %1765 = vmatpush3.msra.mxu1 %v1058_v38  ;;  %1817 = vmatpush3.msra.mxu0 %v1086_v30 }
 0x2f6   :  { %1766 = vmatprep.subr.mxu1 %v1073_v39  ;;  %1818 = vmatprep.subr.mxu0 %v1101_v31 }
 0x2f7   :  { %1767 = vmatpush3.msra.mxu1 %v1057_v41  ;;  %1819 = vmatpush3.msra.mxu0 %v1085_v32 }
 0x2f8   :  { %1768 = vmatprep.subr.mxu1 %v1072_v43  ;;  %1820 = vmatprep.subr.mxu0 %v1100_v33 }
 0x2f9   :  { %1769 = vmatpush3.msra.mxu1 %v1056_v46  ;;  %1821 = vmatpush3.msra.mxu0 %v1084_v34 }
 0x2fa   :  { %1770 = vmatprep.subr.mxu1 %v1071_v52  ;;  %1946 = vmatprep.subr.mxu0 %v2000_v2  ;;  %v1121_v52 = vld [vmem:[%s2858_s2 + $0x228] sm:$0xff] }
 0x2fb   :  { %1771 = vmatpush3.msra.mxu1 %v1055_v54 }
 0x2fc   :  { %1772 = vmatprep.subr.mxu1 %v1070_v56 }
 0x2fd   :  { %1773 = vmatpush3.msra.mxu1 %v1054_v58  ;;  %v1119_v58 = vld [vmem:[%s2858_s2 + $0x218] sm:$0xff] }
 0x2fe   :  { %1774 = vmatprep.subr.mxu1 %v1069_v0  ;;  %v1118_v0 = vld [vmem:[%s2858_s2 + $0x210] sm:$0xff] }
 0x2ff   :  { %1775 = vmatpush3.msra.mxu1 %v1053_v3 }
 0x300   :  { %1776 = vmatprep.subr.mxu1 %v1068_v5 }
 0x301   :  { %1777 = vmatpush3.msra.mxu1 %v1052_v45 }
 0x302   :  { %1924 = vmatprep.subr.mxu1 %v1123_v36 }
 0x359   :  { %v835_v50 = vpop.permute.xlu1 %834  ;;  %v833_v51 = vpop.permute.xlu0 %832 }
 0x35a   :  { %845 = vst.msk [vmem:[#allocation2 + $0x9] sm:$0xff] %vm65_vm5, %v835_v50  ;;  %844 = vst.msk [vmem:[#allocation2 + $0x1] sm:$0xff] %vm65_vm5, %v833_v51  ;;  %v1122_v51 = vld [vmem:[%s2858_s2 + $0x230] sm:$0xff] }
 0x35d   :  { %v839_v60 = vpop.permute.xlu1 %838  ;;  %v837_v61 = vpop.permute.xlu0 %836 }
 0x35e   :  { %847 = vst.msk [vmem:[#allocation2 + $0x21] sm:$0xff] %vm65_vm5, %v839_v60  ;;  %846 = vst.msk [vmem:[#allocation2 + $0x19] sm:$0xff] %vm65_vm5, %v837_v61 }
 0x361   :  { %v904_v62 = vld [vmem:[#allocation2 + $0x1] sm:$0xff]  ;;  %v985_v9 = vld [vmem:[#allocation2 + $0xa] sm:$0xff] }
 0x362   :  { %v880_v63 = vld [vmem:[#allocation2] sm:$0xff]  ;;  %v881_v7 = vld [vmem:[#allocation2 + $0x8] sm:$0xff]  ;;  %912 = vrot.lane.b32.xlu1 %v904_v62, %s2002_s12  ;;  %981 = vst.msk [vmem:[#allocation3 + $0x40] sm:$0xff] %vm74_vm6, %v985_v9 }
 0x363   :  { %888 = vrot.lane.b32.xlu0 %v880_v63, %s2003_s13  ;;  %v984_v8 = vld [vmem:[#allocation2 + $0x2] sm:$0xff]  ;;  %852 = vst.msk [vmem:[#allocation3] sm:$0xff] %vm74_vm6, %v880_v63  ;;  %853 = vst.msk [vmem:[#allocation3 + $0x28] sm:$0xff] %vm74_vm6, %v881_v7 }
 0x364   :  { %980 = vst.msk [vmem:[#allocation3 + $0x18] sm:$0xff] %vm74_vm6, %v984_v8  ;;  %v905_v28 = vld [vmem:[#allocation2 + $0x9] sm:$0xff] }
 0x365   :  { %v882_v13 = vld [vmem:[#allocation2 + $0x18] sm:$0xff]  ;;  %v883_v14 = vld [vmem:[#allocation2 + $0x20] sm:$0xff] }
 0x366   :  { %890 = vrot.lane.b32.xlu1 %v881_v7, %s2003_s13  ;;  %v986_v24 = vld [vmem:[#allocation2 + $0x1a] sm:$0xff]  ;;  %v987_v25 = vld [vmem:[#allocation2 + $0x22] sm:$0xff]  ;;  %854 = vst.msk [vmem:[#allocation3 + $0x50] sm:$0xff] %vm74_vm6, %v882_v13  ;;  %855 = vst.msk [vmem:[#allocation3 + $0x78] sm:$0xff] %vm74_vm6, %v883_v14 }
 0x367   :  { %864 = vrot.lane.b32.xlu0 %v880_v63, %s2004_s23  ;;  %982 = vst.msk [vmem:[#allocation3 + $0x68] sm:$0xff] %vm74_vm6, %v986_v24  ;;  %983 = vst.msk [vmem:[#allocation3 + $0x90] sm:$0xff] %vm74_vm6, %v987_v25  ;;  %v906_v35 = vld [vmem:[#allocation2 + $0x19] sm:$0xff]  ;;  %v907_v37 = vld [vmem:[#allocation2 + $0x21] sm:$0xff] }
 0x36a   :  { %866 = vrot.lane.b32.xlu1 %v881_v7, %s2004_s23 }
 0x36b   :  { %914 = vrot.lane.b32.xlu0 %v905_v28, %s2002_s12 }
 0x36e   :  { %992 = vrot.lane.b32.xlu1 %v984_v8, %s2004_s23 }
 0x36f   :  { %936 = vrot.lane.b32.xlu0 %v904_v62, %s2005_s15 }
 0x372   :  { %960 = vrot.lane.b32.xlu1 %v904_v62, %s2006_s16 }
 0x373   :  { %892 = vrot.lane.b32.xlu0 %v882_v13, %s2003_s13 }
 0x376   :  { %868 = vrot.lane.b32.xlu1 %v882_v13, %s2004_s23 }
 0x377   :  { %916 = vrot.lane.b32.xlu0 %v906_v35, %s2002_s12 }
 0x37a   :  { %994 = vrot.lane.b32.xlu1 %v985_v9, %s2004_s23 }
 0x37b   :  { %938 = vrot.lane.b32.xlu0 %v905_v28, %s2005_s15 }
 0x37e   :  { %962 = vrot.lane.b32.xlu1 %v905_v28, %s2006_s16 }
 0x37f   :  { %894 = vrot.lane.b32.xlu0 %v883_v14, %s2003_s13 }
 0x382   :  { %870 = vrot.lane.b32.xlu1 %v883_v14, %s2004_s23 }
 0x383   :  { %918 = vrot.lane.b32.xlu0 %v907_v37, %s2002_s12 }
 0x386   :  { %996 = vrot.lane.b32.xlu1 %v986_v24, %s2004_s23 }
 0x387   :  { %940 = vrot.lane.b32.xlu0 %v906_v35, %s2005_s15 }
 0x38a   :  { %1016 = vrot.lane.b32.xlu1 %v984_v8, %s2003_s13 }
 0x38b   :  { %964 = vrot.lane.b32.xlu0 %v906_v35, %s2006_s16 }
 0x38e   :  { %942 = vrot.lane.b32.xlu1 %v907_v37, %s2005_s15 }
 0x38f   :  { %1018 = vrot.lane.b32.xlu0 %v985_v9, %s2003_s13 }
 0x392   :  { %966 = vrot.lane.b32.xlu1 %v907_v37, %s2006_s16 }
 0x393   :  { %998 = vrot.lane.b32.xlu0 %v987_v25, %s2004_s23 }
 0x396   :  { %1022 = vrot.lane.b32.xlu1 %v987_v25, %s2003_s13 }
 0x397   :  { %1020 = vrot.lane.b32.xlu0 %v986_v24, %s2003_s13 }
 0x3d4   :  { %v913_v38 = vpop.permute.xlu1 %912 }
 0x3d5   :  { %v889_v39 = vpop.permute.xlu0 %888 }
 0x3d6   :  { %900 = vst.msk [vmem:[#allocation3 + $0x8] sm:$0xff] %vm74_vm6, %v889_v39 }
 0x3d7   :  { %924 = vst.msk [vmem:[#allocation3 + $0x8] sm:$0xff] %vm99_vm7, %v913_v38 }
 0x3d8   :  { %v891_v40 = vpop.permute.xlu1 %890 }
 0x3d9   :  { %v865_v41 = vpop.permute.xlu0 %864  ;;  %901 = vst.msk [vmem:[#allocation3 + $0x30] sm:$0xff] %vm74_vm6, %v891_v40 }
 0x3da   :  { %876 = vst.msk [vmem:[#allocation3] sm:$0xff] %vm99_vm7, %v865_v41 }
 0x3dc   :  { %v867_v42 = vpop.permute.xlu1 %866 }
 0x3dd   :  { %v915_v43 = vpop.permute.xlu0 %914  ;;  %877 = vst.msk [vmem:[#allocation3 + $0x28] sm:$0xff] %vm99_vm7, %v867_v42 }
 0x3de   :  { %925 = vst.msk [vmem:[#allocation3 + $0x30] sm:$0xff] %vm99_vm7, %v915_v43  ;;  %v1033_v44 = vld [vmem:[#allocation3 + $0x8] sm:$0xff] }
 0x3df   :  { %1200 = vmatprep.mubr.f32.mxu1 %v1033_v44 }
 0x3e0   :  { %v993_v46 = vpop.permute.xlu1 %992 }
 0x3e1   :  { %v937_v49 = vpop.permute.xlu0 %936  ;;  %v1032_v50 = vld [vmem:[#allocation3] sm:$0xff]  ;;  %1004 = vst.msk [vmem:[#allocation3 + $0x18] sm:$0xff] %vm99_vm7, %v993_v46 }
 0x3e2   :  { %948 = vst.msk [vmem:[#allocation3 + $0x10] sm:$0xff] %vm74_vm6, %v937_v49  ;;  %1201 = vmatmul.mubr.f32.vlgmr.msra.gmra.mxu1 %v1032_v50 }
 0x3e3   :  { %1925 = vmatpush3.msra.mxu1 %v1123_v36 }
 0x3e4   :  { %1926 = vmatprep.subr.mxu1 %v1122_v51  ;;  %v961_v53 = vpop.permute.xlu1 %960  ;;  %v1037_v56 = vld [vmem:[#allocation3 + $0x28] sm:$0xff] }
 0x3e5   :  { %v893_v54 = vpop.permute.xlu0 %892  ;;  %v1038_v55 = vld [vmem:[#allocation3 + $0x30] sm:$0xff]  ;;  %1927 = vmatpush3.msra.mxu1 %v1122_v51  ;;  %972 = vst.msk [vmem:[#allocation3 + $0x10] sm:$0xff] %vm99_vm7, %v961_v53 }
 0x3e6   :  { %902 = vst.msk [vmem:[#allocation3 + $0x58] sm:$0xff] %vm74_vm6, %v893_v54  ;;  %1205 = vmatprep.mubr.f32.mxu1 %v1038_v55  ;;  %1928 = vmatprep.subr.mxu1 %v1121_v52 }
 0x3e7   :  { %1206 = vmatmul.mubr.f32.gmra.mxu1 %v1037_v56 }
 0x3e8   :  { %1929 = vmatpush3.msra.mxu1 %v1121_v52  ;;  %v869_v59 = vpop.permute.xlu1 %868  ;;  %v1035_v61 = vld [vmem:[#allocation3 + $0x18] sm:$0xff] }
 0x3e9   :  { %v917_v60 = vpop.permute.xlu0 %916  ;;  %1930 = vmatprep.subr.mxu1 %v1120_v57  ;;  %878 = vst.msk [vmem:[#allocation3 + $0x50] sm:$0xff] %vm99_vm7, %v869_v59  ;;  %1285 = vmatprep.mubr.f32.mxu0 %v1035_v61 }
 0x3ea   :  { %926 = vst.msk [vmem:[#allocation3 + $0x58] sm:$0xff] %vm99_vm7, %v917_v60  ;;  %1931 = vmatpush3.msra.mxu1 %v1120_v57 }
 0x3eb   :  { %1932 = vmatprep.subr.mxu1 %v1119_v58 }
 0x3ec   :  { %1933 = vmatpush3.msra.mxu1 %v1119_v58  ;;  %v995_v3 = vpop.permute.xlu1 %994  ;;  %v1034_v5 = vld [vmem:[#allocation3 + $0x10] sm:$0xff] }
 0x3ed   :  { %v939_v4 = vpop.permute.xlu0 %938  ;;  %1934 = vmatprep.subr.mxu1 %v1118_v0  ;;  %1005 = vst.msk [vmem:[#allocation3 + $0x40] sm:$0xff] %vm99_vm7, %v995_v3  ;;  %1286 = vmatmul.mubr.f32.vlgmr.msra.gmra.mxu0 %v1034_v5 }
 0x3ee   :  { %949 = vst.msk [vmem:[#allocation3 + $0x38] sm:$0xff] %vm74_vm6, %v939_v4  ;;  %1935 = vmatpush3.msra.mxu1 %v1118_v0  ;;  %1947 = vmatpush3.msra.mxu0 %v2371_v15 }
 0x3ef   :  { %1936 = vmatprep.subr.mxu1 %v1117_v1  ;;  %1948 = vmatprep.subr.mxu0 %v2000_v2 }
 0x3f0   :  { %1937 = vmatpush3.msra.mxu1 %v1117_v1  ;;  %v963_v45 = vpop.permute.xlu1 %962  ;;  %v1042_v63 = vld [vmem:[#allocation3 + $0x50] sm:$0xff]  ;;  %1949 = vmatpush3.msra.mxu0 %v2379_v16 }
 0x3f1   :  { %v895_v48 = vpop.permute.xlu0 %894  ;;  %v1043_v62 = vld [vmem:[#allocation3 + $0x58] sm:$0xff]  ;;  %1938 = vmatprep.subr.mxu1 %v1116_v6  ;;  %973 = vst.msk [vmem:[#allocation3 + $0x38] sm:$0xff] %vm99_vm7, %v963_v45  ;;  %1950 = vmatprep.subr.mxu0 %v2000_v2 }
 0x3f2   :  { %903 = vst.msk [vmem:[#allocation3 + $0x80] sm:$0xff] %vm74_vm6, %v895_v48  ;;  %1210 = vmatprep.mubr.f32.mxu1 %v1043_v62  ;;  %1939 = vmatpush3.msra.mxu1 %v1116_v6 }
 0x3f3   :  { %1211 = vmatmul.mubr.f32.gmra.mxu1 %v1042_v63  ;;  %1965 = vmatprep.subr.mxu1 %v2000_v2 }
 0x3f4   :  { %v871_v7 = vpop.permute.xlu1 %870  ;;  %v1040_v9 = vld [vmem:[#allocation3 + $0x40] sm:$0xff]  ;;  %1951 = vmatpush3.msra.mxu0 %v2388_v17 }
 0x3f5   :  { %v919_v8 = vpop.permute.xlu0 %918  ;;  %879 = vst.msk [vmem:[#allocation3 + $0x78] sm:$0xff] %vm99_vm7, %v871_v7  ;;  %1290 = vmatprep.mubr.f32.mxu0 %v1040_v9  ;;  %1952 = vmatprep.subr.mxu0 %v2000_v2 }
 0x3f6   :  { %927 = vst.msk [vmem:[#allocation3 + $0x80] sm:$0xff] %vm99_vm7, %v919_v8  ;;  %1953 = vmatpush3.msra.mxu0 %v2397_v18 }
 0x3f7   :  { %1954 = vmatprep.subr.mxu0 %v2000_v2 }
 0x3f8   :  { %v997_v10 = vpop.permute.xlu1 %996  ;;  %v1039_v12 = vld [vmem:[#allocation3 + $0x38] sm:$0xff]  ;;  %1955 = vmatpush3.msra.mxu0 %v2406_v19 }
 0x3f9   :  { %v941_v11 = vpop.permute.xlu0 %940  ;;  %1006 = vst.msk [vmem:[#allocation3 + $0x68] sm:$0xff] %vm99_vm7, %v997_v10  ;;  %1291 = vmatmul.mubr.f32.gmra.mxu0 %v1039_v12  ;;  %1956 = vmatprep.subr.mxu0 %v2000_v2 }
 0x3fa   :  { %950 = vst.msk [vmem:[#allocation3 + $0x60] sm:$0xff] %vm74_vm6, %v941_v11  ;;  %1957 = vmatpush3.msra.mxu0 %v2415_v20 }
 0x3fb   :  { %1958 = vmatprep.subr.mxu0 %v2000_v2 }
 0x3fc   :  { %v1017_v13 = vpop.permute.xlu1 %1016  ;;  %v1047_v24 = vld [vmem:[#allocation3 + $0x78] sm:$0xff]  ;;  %1959 = vmatpush3.msra.mxu0 %v2424_v21 }
 0x3fd   :  { %v965_v14 = vpop.permute.xlu0 %964  ;;  %v1048_v23 = vld [vmem:[#allocation3 + $0x80] sm:$0xff]  ;;  %1028 = vst.msk [vmem:[#allocation3 + $0x20] sm:$0xff] %vm74_vm6, %v1017_v13  ;;  %1960 = vmatprep.subr.mxu0 %v2000_v2 }
 0x3fe   :  { %974 = vst.msk [vmem:[#allocation3 + $0x60] sm:$0xff] %vm99_vm7, %v965_v14  ;;  %1215 = vmatprep.mubr.f32.mxu1 %v1048_v23  ;;  %1961 = vmatpush3.msra.mxu0 %v2433_v22 }
 0x3ff   :  { %1216 = vmatmul.mubr.f32.gmra.mxu1 %v1047_v24 }
 0x400   :  { %v943_v25 = vpop.permute.xlu1 %942  ;;  %v1045_v27 = vld [vmem:[#allocation3 + $0x68] sm:$0xff] }
 0x401   :  { %v1019_v26 = vpop.permute.xlu0 %1018  ;;  %951 = vst.msk [vmem:[#allocation3 + $0x88] sm:$0xff] %vm74_vm6, %v943_v25  ;;  %1295 = vmatprep.mubr.f32.mxu0 %v1045_v27 }
 0x402   :  { %1029 = vst.msk [vmem:[#allocation3 + $0x48] sm:$0xff] %vm74_vm6, %v1019_v26 }
 0x404   :  { %v967_v28 = vpop.permute.xlu1 %966  ;;  %v1036_v31 = vld [vmem:[#allocation3 + $0x20] sm:$0xff] }
 0x405   :  { %v999_v29 = vpop.permute.xlu0 %998  ;;  %v1044_v30 = vld [vmem:[#allocation3 + $0x60] sm:$0xff]  ;;  %975 = vst.msk [vmem:[#allocation3 + $0x88] sm:$0xff] %vm99_vm7, %v967_v28  ;;  %1940 = vmatprep.mubr.msk.f32.mxu1 %vm74_vm6, %v1036_v31 }
 0x406   :  { %1007 = vst.msk [vmem:[#allocation3 + $0x90] sm:$0xff] %vm99_vm7, %v999_v29  ;;  %1296 = vmatmul.mubr.f32.gmra.mxu0 %v1044_v30 }
 0x408   :  { %v1023_v32 = vpop.permute.xlu1 %1022 }
 0x409   :  { %v1021_v33 = vpop.permute.xlu0 %1020  ;;  %v1041_v34 = vld [vmem:[#allocation3 + $0x48] sm:$0xff]  ;;  %1031 = vst.msk [vmem:[#allocation3 + $0x98] sm:$0xff] %vm74_vm6, %v1023_v32 }
 0x40a   :  { %1030 = vst.msk [vmem:[#allocation3 + $0x70] sm:$0xff] %vm74_vm6, %v1021_v33  ;;  %1941 = vmatmul.mubr.msk.f32.vlgmr.msra.gmra.mxu1 %vm74_vm6, %v1041_v34 }
 0x40b   :  { %1966 = vmatpush3.msra.mxu1 %v2371_v15 }
 0x40c   :  { %1967 = vmatprep.subr.mxu1 %v2000_v2  ;;  %v1049_v36 = vld [vmem:[#allocation3 + $0x88] sm:$0xff] }
 0x40d   :  { %v1050_v35 = vld [vmem:[#allocation3 + $0x90] sm:$0xff]  ;;  %1968 = vmatpush3.msra.mxu1 %v2379_v16 }
 0x40e   :  { %1300 = vmatprep.mubr.f32.mxu0 %v1050_v35  ;;  %1969 = vmatprep.subr.mxu1 %v2000_v2 }
 0x40f   :  { %1301 = vmatmul.mubr.f32.gmra.mxu0 %v1049_v36  ;;  %1970 = vmatpush3.msra.mxu1 %v2388_v17 }
 0x410   :  { %1971 = vmatprep.subr.mxu1 %v2000_v2  ;;  %1962 = vmatprep.mubr.msk.f32.mxu0 %vm2007_vm8, %v2000_v2  ;;  %v1051_v38 = vld [vmem:[#allocation3 + $0x98] sm:$0xff] }
 0x411   :  { %v1046_v37 = vld [vmem:[#allocation3 + $0x70] sm:$0xff]  ;;  %1972 = vmatpush3.msra.mxu1 %v2397_v18 }
 0x412   :  { %1943 = vmatprep.mubr.msk.f32.mxu1 %vm74_vm6, %v1046_v37  ;;  %1973 = vmatprep.subr.mxu1 %v2000_v2 }
 0x413   :  { %1944 = vmatmul.mubr.msk.f32.gmra.mxu1 %vm74_vm6, %v1051_v38 }
 0x414   :  { %1974 = vmatpush3.msra.mxu1 %v2406_v19  ;;  %1981 = vmatprep.mubr.msk.f32.mxu1 %vm2007_vm8, %v2000_v2 }
 0x415   :  { %1975 = vmatprep.subr.mxu1 %v2000_v2 }
 0x416   :  { %1976 = vmatpush3.msra.mxu1 %v2415_v20 }
 0x417   :  { %1977 = vmatprep.subr.mxu1 %v2000_v2 }
 0x418   :  { %1978 = vmatpush3.msra.mxu1 %v2424_v21 }
 0x419   :  { %1979 = vmatprep.subr.mxu1 %v2000_v2 }
 0x41a   :  { %1980 = vmatpush3.msra.mxu1 %v2433_v22 }
 0x4a2   :  { %v1778_v15 = vpop.f32.mrf.mxu1 }
 0x4a4   :  { %v1779_v16 = vpop.f32.mrf.mxu1 }
 0x4a5   :  { %v1780_v50 = vadd.f32 %v1779_v16, %v1778_v15 }
 0x4a7   :  { %v1781_v17 = vpop.f32.mrf.mxu1 }
 0x4a9   :  { %v1782_v18 = vpop.f32.mrf.mxu1 }
 0x4aa   :  { %v1783_v2 = vadd.f32 %v1782_v18, %v1781_v17 }
 0x4ad   :  { %v1822_v19 = vpop.f32.mrf.mxu0 }
 0x4af   :  { %v1823_v40 = vpop.f32.mrf.mxu0 }
 0x4b0   :  { %v1824_v20 = vadd.f32 %v1823_v40, %v1822_v19 }
 0x4b2   :  { %v1288_v52 = vadd.f32 %v1824_v20, %v1780_v50 }
 0x4b3   :  { %v1784_v39 = vpop.f32.mrf.mxu1 }
 0x4b5   :  { %v1785_v41 = vpop.f32.mrf.mxu1 }
 0x4b6   :  { %v1786_v60 = vadd.f32 %v1785_v41, %v1784_v39 }
 0x4b9   :  { %v1825_v42 = vpop.f32.mrf.mxu0 }
 0x4bb   :  { %v1826_v44 = vpop.f32.mrf.mxu0 }
 0x4bc   :  { %v1827_v21 = vadd.f32 %v1826_v44, %v1825_v42 }
 0x4be   :  { %v1293_v54 = vadd.f32 %v1827_v21, %v1783_v2  ;;  %v48_v21 = vld [vmem:[%s2857_s3 + $0x3] sm:$0x1] }
 0x4bf   :  { %v1787_v43 = vpop.f32.mrf.mxu1 }
 0x4c1   :  { %v1788_v46 = vpop.f32.mrf.mxu1 }
 0x4c2   :  { %v1789_v61 = vadd.f32 %v1788_v46, %v1787_v43  ;;  %v47_v46 = vld [vmem:[%s2857_s3 + $0x2] sm:$0x1] }
 0x4c6   :  { %v1828_v49 = vpop.f32.mrf.mxu0 }
 0x4c8   :  { %v1829_v53 = vpop.f32.mrf.mxu0 }
 0x4c9   :  { %v1830_v57 = vadd.f32 %v1829_v53, %v1828_v49 }
 0x4ca   :  { %v1942_v51 = vpop.f32.mrf.mxu1 }
 0x4cb   :  { %v1378_v58 = vadd.f32 %v1942_v51, %v1293_v54  ;;  %v1298_v45 = vadd.f32 %v1830_v57, %v1786_v60 }
 0x4cc   :  { %v1372_v22 = vpop.f32.mrf.mxu1 }
 0x4cd   :  { %v2802_v55 = vadd.f32 %v1372_v22, %v1288_v52  ;;  %v1405_v4 = vmul.f32 %v1378_v58, %v1378_v58  ;;  %v1392_v62 = vsel %vm74_vm6, %v1378_v58, 0.0 }
 0x4cf   :  { %v1831_v56 = vpop.f32.mrf.mxu0  ;;  %v1404_v0 = vmul.f32 %v2802_v55, %v2802_v55  ;;  %v1391_v5 = vsel %vm74_vm6, %v2802_v55, 0.0  ;;  %v1409_v10 = vsel %vm74_vm6, %v1405_v4, 0.0  ;;  %v1997_v4 = vld [vmem:[%s2854_s0 + $0x8] sm:$0xff] }
 0x4d0   :  { %v1393_v9 = vadd.f32 %v1392_v62, %v1391_v5 }
 0x4d1   :  { %v1832_v59 = vpop.f32.mrf.mxu0  ;;  %v1408_v63 = vsel %vm74_vm6, %v1404_v0, 0.0 }
 0x4d2   :  { %v1833_v1 = vadd.f32 %v1832_v59, %v1831_v56  ;;  %v1410_v14 = vadd.f32 %v1409_v10, %v1408_v63 }
 0x4d3   :  { %v1945_v3 = vpop.f32.mrf.mxu1 }
 0x4d4   :  { %v1303_v6 = vadd.f32 %v1833_v1, %v1789_v61  ;;  %v1996_v1 = vld [vmem:[%s2854_s0] sm:$0xff] }
 0x4d5   :  { %v1382_v48 = vpop.f32.mrf.mxu1 }
 0x4d6   :  { %v1388_v7 = vadd.f32 %v1945_v3, %v1303_v6  ;;  %v1383_v8 = vadd.f32 %v1382_v48, %v1298_v45 }
 0x4d8   :  { %v1407_v11 = vmul.f32 %v1388_v7, %v1388_v7  ;;  %v1394_v12 = vsel %vm74_vm6, %v1383_v8, 0.0  ;;  %v1406_v13 = vmul.f32 %v1383_v8, %v1383_v8  ;;  %v1396_v24 = vsel %vm74_vm6, %v1388_v7, 0.0 }
 0x4d9   :  { %v1395_v23 = vadd.f32 %v1394_v12, %v1393_v9 }
 0x4da   :  { %v1411_v25 = vsel %vm74_vm6, %v1406_v13, 0.0  ;;  %v1413_v28 = vsel %vm74_vm6, %v1407_v11, 0.0 }
 0x4db   :  { %v1397_v26 = vadd.f32 %v1396_v24, %v1395_v23  ;;  %v1412_v27 = vadd.f32 %v1411_v25, %v1410_v14 }
 0x4dd   :  { %v1398_v29 = vrot.slane %v1397_v26, 4  ;;  %v1414_v30 = vadd.f32 %v1413_v28, %v1412_v27 }
 0x4df   :  { %v1399_v31 = vadd.f32 %v1398_v29, %v1397_v26  ;;  %v1415_v32 = vrot.slane %v1414_v30, 4 }
 0x4e1   :  { %v1400_v33 = vrot.slane %v1399_v31, 2  ;;  %v1416_v34 = vadd.f32 %v1415_v32, %v1414_v30 }
 0x4e3   :  { %v1401_v35 = vadd.f32 %v1400_v33, %v1399_v31  ;;  %v1417_v36 = vrot.slane %v1416_v34, 2 }
 0x4e5   :  { %v1402_v37 = vrot.slane %v1401_v35, 1  ;;  %v1418_v38 = vadd.f32 %v1417_v36, %v1416_v34 }
 0x4e7   :  { %v1403_v15 = vadd.f32 %v1402_v37, %v1401_v35  ;;  %v1419_v16 = vrot.slane %v1418_v38, 1 }
 0x4e9   :  { %v1420_v17 = vadd.f32 %v1419_v16, %v1418_v38  ;;  %1963 = vmatmul.mubr.msk.f32.vlgmr.msra.gmra.mxu0 %vm74_vm6, %v1403_v15 }
 0x4eb   :  { %1982 = vmatmul.mubr.msk.f32.vlgmr.msra.gmra.mxu1 %vm74_vm6, %v1420_v17 }
 0x5a9   :  { %v1498_v18 = vpop.f32.mrf.mxu0 }
 0x5aa   :  { %v1502_v19 = vmul.f32 0.001953125, %v1498_v18 }
 0x5ab   :  { %v1964_v39 = vpop.f32.mrf.mxu0  ;;  %v1572_v40 = vpop.f32.mrf.mxu1 }
 0x5ac   :  { %v1577_v41 = vmul.f32 %v1502_v19, %v1502_v19  ;;  %v1576_v42 = vmul.f32 0.001953125, %v1572_v40 }
 0x5ad   :  { %v1983_v43 = vpop.f32.mrf.mxu1 }
 0x5ae   :  { %v1578_v44 = vsub.f32 %v1576_v42, %v1577_v41 }
 0x5b0   :  { %v1579_v20 = vadd.f32 1e-05, %v1578_v44 }
 0x5b2   :  { %1994 = vrsqrt.f32 %v1579_v20 }
 0x5bf   :  { %v1995_v49 = vpop.eup %1994 }
 0x5c0   :  { %v1581_v50 = vmul.f32 %v1995_v49, %v47_v46 }
 0x5c2   :  { %v1582_v51 = vmul.f32 %v1581_v50, %v1502_v19  ;;  %v1587_v2 = vrot.slane %v1581_v50, %v2465_v47 }
 0x5c4   :  { %v1583_v52 = vsub.f32 %v48_v21, %v1582_v51  ;;  %v1588_v22 = vmul.f32 %v1587_v2, %v2802_v55  ;;  %v1589_v53 = vmul.f32 %v1587_v2, %v1378_v58  ;;  %v1590_v54 = vmul.f32 %v1587_v2, %v1383_v8  ;;  %v1998_v55 = vld [vmem:[%s2854_s0 + $0x10] sm:$0xff] }
 0x5c5   :  { %v1591_v56 = vmul.f32 %v1587_v2, %v1388_v7 }
 0x5c6   :  { %v1595_v57 = vrot.slane %v1583_v52, %v2465_v47  ;;  %v1999_v47 = vld [vmem:[%s2854_s0 + $0x18] sm:$0xff] }
 0x5c8   :  { %v1596_v59 = vadd.f32 %v1595_v57, %v1588_v22  ;;  %v1597_v60 = vadd.f32 %v1595_v57, %v1589_v53  ;;  %v1598_v61 = vadd.f32 %v1595_v57, %v1590_v54  ;;  %v1599_v0 = vadd.f32 %v1595_v57, %v1591_v56 }
 0x5ca   :  { %v1600_v3 = vadd.f32 %v1996_v1, %v1596_v59  ;;  %v1601_v5 = vadd.f32 %v1997_v4, %v1597_v60  ;;  %v1602_v58 = vadd.f32 %v1998_v55, %v1598_v61  ;;  %v1603_v6 = vadd.f32 %v1999_v47, %v1599_v0 }
 0x5cc   :  { %v1604_v45 = vmax.f32 %v1600_v3, 0.0  ;;  %v1605_v48 = vmax.f32 %v1601_v5, 0.0  ;;  %v1606_v62 = vmax.f32 %v1602_v58, 0.0  ;;  %v1607_v63 = vmax.f32 %v1603_v6, 0.0 }
 0x5ce   :  { %1608 = vst.msk [vmem:[%s2859_s5] sm:$0xff] %vm74_vm6, %v1604_v45  ;;  %1609 = vst.msk [vmem:[%s2859_s5 + $0x8] sm:$0xff] %vm74_vm6, %v1605_v48 }
 0x5cf   :  { %1610 = vst.msk [vmem:[%s2859_s5 + $0x10] sm:$0xff] %vm74_vm6, %v1606_v62  ;;  %1611 = vst.msk [vmem:[%s2859_s5 + $0x18] sm:$0xff] %vm74_vm6, %v1607_v63 }

</bundles_post_ra>
